<compile_context>
chip_gen: v6e
topology: v6e:2x2x1
jax: 0.10.0
libtpu: 0.0.40
codegen_flags: <defaults>
</compile_context>

<pallas_src>
import math
import jax
import jax.numpy as jnp
from jax.experimental import pallas as pl
from jax.experimental.pallas import tpu as pltpu


B_BLK = 8  # patients per grid step (fills the 8 sublanes of every f32 vreg)


def retain_kernel(gi_ref, ve_ref, whh_ref, bhh_ref,
                  wb_ref, bb_ref, wo_ref, bo_ref, out_ref):
    Bb = out_ref.shape[0]              # patient-block rows (= B_BLK = 8)
    H2 = whh_ref.shape[0]              # 2*E : fused [h_alpha | h_beta] width (=128)
    G2 = 2 * H2                        # width of the packed [r | z] gate section
    T = gi_ref.shape[0] // Bb          # visits per patient

    # Only the recurrent weight/bias are live across the unrolled recurrence; the
    # (128, 384) RHS stays VMEM/MXU-stationary for all T steps.
    w_blk = whh_ref[...]               # (2E, 6E) gate-interleaved block-diagonal
    bhh = bhh_ref[...]                 # (1, 6E)

    h = jnp.zeros((Bb, H2), jnp.float32)   # [h_alpha | h_beta] for the whole block
    hs = []                                 # per-timestep hidden states, kept in vregs
    # T is small & static -> unrolled; the GRU recurrence is inherently sequential, but
    # each step is now one full (Bb,128)@(128,384) matmul instead of M=1.
    for t in range(T):
        gi = gi_ref[t * Bb:(t + 1) * Bb, :]                                 # (Bb, 6E)
        gh = jnp.dot(h, w_blk, preferred_element_type=jnp.float32) + bhh    # (Bb, 6E)
        rz = jax.nn.sigmoid(gi[:, :G2] + gh[:, :G2])   # (Bb, 4E) = [r_a r_b z_a z_b]
        r = rz[:, :H2]
        z = rz[:, H2:]
        n = jnp.tanh(gi[:, G2:] + r * gh[:, G2:])
        h = (1.0 - z) * n + z * h
        hs.append(h)

    # Batched epilogue over all (timestep, patient) rows at once.
    # attn_g = softmax over a size-1 last axis == 1.0 exactly -> alpha head omitted.
    h_all = jnp.concatenate(hs, axis=0)                                     # (T*Bb, 2E)
    attn_h = jnp.tanh(
        jnp.dot(h_all, wb_ref[...], preferred_element_type=jnp.float32) + bb_ref[...])  # (T*Bb, E)
    prod = attn_h * ve_ref[...]                                             # (T*Bb, E)
    # context: c[b] = sum_t prod[t*Bb + b]  (rows are t-major, patient-minor; slices are
    # 8-sublane aligned so this is T-1 plain vector adds)
    c = prod[0:Bb, :]
    for t in range(1, T):
        c = c + prod[t * Bb:(t + 1) * Bb, :]
    out_ref[...] = jnp.dot(c, wo_ref[...], preferred_element_type=jnp.float32) + bo_ref[...]


def fuse_params(params, out_pad=128):
    """Build fused/aligned weights from the per-module (pre-transposed) parameters."""
    (wih_a, whh_a, bih_a, bhh_a,
     wih_b, whh_b, bih_b, bhh_b,
     wa, ba, wb, bb, wo, bo) = params
    E = wih_a.shape[0]

    def split_w(w):   # (E, 3E) -> r, z, n blocks, each (E, E)
        return w[:, :E], w[:, E:2 * E], w[:, 2 * E:]

    def split_b(b):   # (1, 3E) -> r, z, n blocks, each (1, E)
        return b[:, :E], b[:, E:2 * E], b[:, 2 * E:]

    # Input weights: columns ordered [r_a r_b | z_a z_b | n_a n_b]  -> (E, 6E)
    ra, za, na = split_w(wih_a)
    rb, zb, nb = split_w(wih_b)
    wih_cat = jnp.concatenate([ra, rb, za, zb, na, nb], axis=1)
    bra, bza, bna = split_b(bih_a)
    brb, bzb, bnb = split_b(bih_b)
    bih_cat = jnp.concatenate([bra, brb, bza, bzb, bna, bnb], axis=1)       # (1, 6E)

    # Recurrent weights: block-diagonal over [h_a | h_b], same gate-interleaved columns.
    Ra, Za, Na = split_w(whh_a)
    Rb, Zb, Nb = split_w(whh_b)
    zer = jnp.zeros((E, E), jnp.float32)
    top = jnp.concatenate([Ra, zer, Za, zer, Na, zer], axis=1)              # h_a rows
    bot = jnp.concatenate([zer, Rb, zer, Zb, zer, Nb], axis=1)              # h_b rows
    whh_cat = jnp.concatenate([top, bot], axis=0)                           # (2E, 6E)
    bra2, bza2, bna2 = split_b(bhh_a)
    brb2, bzb2, bnb2 = split_b(bhh_b)
    bhh_cat = jnp.concatenate([bra2, brb2, bza2, bzb2, bna2, bnb2], axis=1)  # (1, 6E)

    # beta_li consumes only the h_b half of the fused hidden state.
    wb_pad = jnp.concatenate([jnp.zeros((E, E), jnp.float32), wb], axis=0)  # (2E, E)

    # output Linear padded to a lane-dense 128-wide store.
    out_len = wo.shape[1]
    wo_pad = jnp.pad(wo, ((0, 0), (0, out_pad - out_len)))                  # (E, 128)
    bo_pad = jnp.pad(bo, ((0, 0), (0, out_pad - out_len)))                  # (1, 128)

    # NOTE: wa/ba (alpha_li) are dropped: softmax over a size-1 axis is identically 1.0.
    return wih_cat, bih_cat, whh_cat, bhh_cat, wb_pad, bb, wo_pad, bo_pad, out_len


def retain_forward(visit_emb, fused):
    """visit_emb: (B, T, E) f32. Returns (B, output_len) f32."""
    wih_cat, bih_cat, whh_cat, bhh_cat, wb_pad, bb, wo_pad, bo_pad, out_len = fused
    B, T, E = visit_emb.shape
    OUT_PAD = wo_pad.shape[1]

    # Pad the patient dim up to a multiple of B_BLK; padded rows produce finite garbage
    # that is sliced off at the end (rows are independent).
    NB = pl.cdiv(B, B_BLK)
    B_pad = NB * B_BLK
    ve = jnp.pad(visit_emb, ((0, B_pad - B), (0, 0), (0, 0)))

    # Hoisted input projection (both GRUs, all gates) as one XLA matmul:
    # (B_pad*T, E) @ (E, 6E). The kernel keeps only the sequential part.
    gi = (jnp.dot(ve.reshape(B_pad * T, E), wih_cat,
                  preferred_element_type=jnp.float32) + bih_cat).reshape(B_pad, T, 6 * E)

    def block_layout(x):
        # (B_pad, T, W) -> (NB*T*B_BLK, W); within block nb, row t*B_BLK + b holds
        # patient nb*B_BLK + b at visit t (t-major, patient-minor).
        W = x.shape[-1]
        return x.reshape(NB, B_BLK, T, W).transpose(0, 2, 1, 3).reshape(NB * T * B_BLK, W)

    gi_flat = block_layout(gi)       # (NB*T*B_BLK, 6E)
    ve_flat = block_layout(ve)       # (NB*T*B_BLK, E)

    def const_spec(x):
        return pl.BlockSpec(x.shape, lambda nb: (0, 0))

    out = pl.pallas_call(
        retain_kernel,
        out_shape=jax.ShapeDtypeStruct((B_pad, OUT_PAD), jnp.float32),
        grid_spec=pltpu.PrefetchScalarGridSpec(
            num_scalar_prefetch=0,
            grid=(NB,),
            in_specs=[pl.BlockSpec((T * B_BLK, 6 * E), lambda nb: (nb, 0)),
                      pl.BlockSpec((T * B_BLK, E), lambda nb: (nb, 0)),
                      const_spec(whh_cat), const_spec(bhh_cat),
                      const_spec(wb_pad), const_spec(bb),
                      const_spec(wo_pad), const_spec(bo_pad)],
            out_specs=pl.BlockSpec((B_BLK, OUT_PAD), lambda nb: (nb, 0))),
        compiler_params=pltpu.CompilerParams(
            dimension_semantics=("parallel",)),   # multiple blocks feed both v7x TCs
    )(gi_flat, ve_flat, whh_cat, bhh_cat, wb_pad, bb, wo_pad, bo_pad)
    return out[:B, :out_len]


def retain_reference(visit_emb, params):
    """Pure-JAX reference (single patient, unfused params) for correctness checking."""
    (wih_a, whh_a, bih_a, bhh_a,
     wih_b, whh_b, bih_b, bhh_b,
     wa, ba, wb, bb, wo, bo) = params
    E = visit_emb.shape[1]

    def gru(x_seq, wih, whh, bih, bhh):
        def step(h, x):
            x = x[None, :]
            gi = x @ wih + bih
            gh = h @ whh + bhh
            r = jax.nn.sigmoid(gi[:, :E] + gh[:, :E])
            z = jax.nn.sigmoid(gi[:, E:2 * E] + gh[:, E:2 * E])
            n = jnp.tanh(gi[:, 2 * E:] + r * gh[:, 2 * E:])
            h_new = (1.0 - z) * n + z * h
            return h_new, h_new[0]
        _, hs = jax.lax.scan(step, jnp.zeros((1, E), jnp.float32), x_seq)
        return hs

    g = gru(visit_emb, wih_a, whh_a, bih_a, bhh_a)
    h = gru(visit_emb, wih_b, whh_b, bih_b, bhh_b)
    attn_g = jax.nn.softmax(g @ wa + ba, axis=-1)
    attn_h = jnp.tanh(h @ wb + bb)
    c = jnp.sum(attn_g * attn_h * visit_emb, axis=0)[None, :]
    return c @ wo + bo


if __name__ == "__main__":
    # ---- model config (per module defaults/semantics) ---------------------
    voc_size = (8, 8, 16)                                  # (diag, proc, med)
    emb_size = 64
    input_len = voc_size[0] + voc_size[1] + voc_size[2]    # 32
    output_len = voc_size[2]                               # 16
    E = emb_size

    # ---- deterministic synthetic patient records (B patients, T visits) ---
    key = jax.random.PRNGKey(0)
    B, T = 4, 6
    base_lens = [(3, 2, 4), (2, 3, 1), (4, 1, 2), (1, 2, 3), (3, 3, 3), (2, 2, 2)]

    keys = jax.random.split(key, B * T * 3 + 16)
    kc = 0
    patients = []
    for b in range(B):
        visits = []
        for (ld, lp, lm) in base_lens:
            d = jax.random.randint(keys[kc], (ld,), 0, voc_size[0]); kc += 1
            p = jax.random.randint(keys[kc], (lp,), 0, voc_size[1]); kc += 1
            m = jax.random.randint(keys[kc], (lm,), 0, voc_size[2]); kc += 1
            visits.append(([int(x) for x in d], [int(x) for x in p], [int(x) for x in m]))
        patients.append(visits)

    # ---- preprocessing exactly as in Retain.forward (glue, plain Python) --
    # padded to a global max_len so patients stack; extra padding rows embed to
    # zero (padding_idx) so the per-visit sum is unchanged.
    max_len = max(len(v[0]) + len(v[1]) + len(v[2]) for pat in patients for v in pat)
    idx_np = []
    for pat in patients:
        rows = []
        for visit in pat:
            row = []
            row.extend(visit[0])
            row.extend([c + voc_size[0] for c in visit[1]])
            row.extend([c + voc_size[0] + voc_size[1] for c in visit[2]])
            row.extend([input_len] * (max_len - len(row)))
            rows.append(row)
        idx_np.append(rows)
    idx = jnp.asarray(idx_np, dtype=jnp.int32)             # (B, T, max_len)

    # ---- deterministic parameter init (shapes from __init__) --------------
    std = 1.0 / math.sqrt(E)

    def uni(k, shape, s):
        return jax.random.uniform(k, shape, jnp.float32, minval=-s, maxval=s)

    pk = keys[kc:]
    emb_table = jax.random.normal(pk[0], (input_len + 1, E), jnp.float32)
    emb_table = emb_table.at[input_len].set(0.0)           # padding_idx row = 0

    # GRUs (PyTorch layout weight_* (3E, E), gates [r,z,n]) -> pre-transposed to (E, 3E)
    wih_a = uni(pk[1], (3 * E, E), std).T
    whh_a = uni(pk[2], (3 * E, E), std).T
    bih_a = uni(pk[3], (1, 3 * E), std)
    bhh_a = uni(pk[4], (1, 3 * E), std)
    wih_b = uni(pk[5], (3 * E, E), std).T
    whh_b = uni(pk[6], (3 * E, E), std).T
    bih_b = uni(pk[7], (1, 3 * E), std)
    bhh_b = uni(pk[8], (1, 3 * E), std)
    # alpha_li: Linear(E, 1)   (only used by the reference; dead in the kernel)
    wa = uni(pk[9], (1, E), std).T
    ba = uni(pk[10], (1, 1), std)
    # beta_li: Linear(E, E)
    wb = uni(pk[11], (E, E), std).T
    bb = uni(pk[12], (1, E), std)
    # output: Linear(E, output_len)
    wo = uni(pk[13], (output_len, E), std).T
    bo = uni(pk[14], (1, output_len), std)

    params = (wih_a, whh_a, bih_a, bhh_a,
              wih_b, whh_b, bih_b, bhh_b,
              wa, ba, wb, bb, wo, bo)

    # ---- glue: embedding gather + per-visit code sum (fuses in XLA) --------
    visit_emb = jnp.sum(jnp.take(emb_table, idx, axis=0), axis=2)   # (B, T, E)

    # ---- fused-weight Pallas kernel ----------------------------------------
    fused = fuse_params(params)
    out = jax.block_until_ready(retain_forward(visit_emb, fused))

    ref = jnp.concatenate([retain_reference(visit_emb[b], params) for b in range(B)], axis=0)
    ref = jax.block_until_ready(ref)

    assert out.shape == (B, output_len)
    assert jnp.allclose(out, ref, atol=1e-3, rtol=1e-3), (out, ref)

    print("KERNEL_OK")
</pallas_src>

<mosaic_0001>
module attributes {stable_mosaic.version = 11 : i64} {
  func.func @retain_kernel(%arg0: i32, %arg1: memref<48x384xf32, #tpu.memory_space<vmem>>, %arg2: memref<48x64xf32, #tpu.memory_space<vmem>>, %arg3: memref<128x384xf32, #tpu.memory_space<vmem>>, %arg4: memref<1x384xf32, #tpu.memory_space<vmem>>, %arg5: memref<128x64xf32, #tpu.memory_space<vmem>>, %arg6: memref<1x64xf32, #tpu.memory_space<vmem>>, %arg7: memref<64x128xf32, #tpu.memory_space<vmem>>, %arg8: memref<1x128xf32, #tpu.memory_space<vmem>>, %arg9: memref<8x128xf32, #tpu.memory_space<vmem>>) attributes {dimension_semantics = [#tpu.dimension_semantics<parallel>], iteration_bounds = array<i64: 1>, scalar_prefetch = 0 : i64, scratch_operands = 0 : i64, tpu.core_type = #tpu.core_type<tc>, window_params = [{transform_indices = @transform_0, window_bounds = array<i64: 48, 384>}, {transform_indices = @transform_1, window_bounds = array<i64: 48, 64>}, {pipeline_mode = #tpu.pipeline_mode<synchronous>, transform_indices = @transform_2, window_bounds = array<i64: 128, 384>}, {pipeline_mode = #tpu.pipeline_mode<synchronous>, transform_indices = @transform_3, window_bounds = array<i64: 1, 384>}, {pipeline_mode = #tpu.pipeline_mode<synchronous>, transform_indices = @transform_4, window_bounds = array<i64: 128, 64>}, {pipeline_mode = #tpu.pipeline_mode<synchronous>, transform_indices = @transform_5, window_bounds = array<i64: 1, 64>}, {pipeline_mode = #tpu.pipeline_mode<synchronous>, transform_indices = @transform_6, window_bounds = array<i64: 64, 128>}, {pipeline_mode = #tpu.pipeline_mode<synchronous>, transform_indices = @transform_7, window_bounds = array<i64: 1, 128>}, {transform_indices = @transform_8, window_bounds = array<i64: 8, 128>}]} {
    %c0 = arith.constant 0 : index
    %c0_0 = arith.constant 0 : index
    %0 = vector.load %arg3[%c0, %c0_0] : memref<128x384xf32, #tpu.memory_space<vmem>>, vector<128x384xf32>
    %c0_1 = arith.constant 0 : index
    %c0_2 = arith.constant 0 : index
    %1 = vector.load %arg4[%c0_1, %c0_2] : memref<1x384xf32, #tpu.memory_space<vmem>>, vector<1x384xf32>
    %cst = arith.constant 0.000000e+00 : f32
    %2 = vector.broadcast %cst : f32 to vector<8x128xf32>
    %c0_3 = arith.constant 0 : index
    %c0_4 = arith.constant 0 : index
    %3 = vector.load %arg1[%c0_3, %c0_4] : memref<48x384xf32, #tpu.memory_space<vmem>>, vector<8x384xf32>
    %cst_5 = arith.constant dense<0.000000e+00> : vector<8x384xf32>
    %4 = tpu.matmul %2, %0, %cst_5 {dimension_numbers = #tpu.dot_dimension_numbers<[1], [0], [0], [1], [0, 0, 1, 1], [], []>} : vector<8x128xf32>, vector<128x384xf32>, vector<8x384xf32> -> vector<8x384xf32>
    %5 = vector.broadcast %1 : vector<1x384xf32> to vector<8x384xf32>
    %6 = arith.addf %4, %5 : vector<8x384xf32>
    %7 = vector.extract_strided_slice %3 {offsets = [0, 0], sizes = [8, 256], strides = [1, 1]} : vector<8x384xf32> to vector<8x256xf32>
    %8 = vector.extract_strided_slice %6 {offsets = [0, 0], sizes = [8, 256], strides = [1, 1]} : vector<8x384xf32> to vector<8x256xf32>
    %9 = arith.addf %7, %8 : vector<8x256xf32>
    %10 = arith.negf %9 : vector<8x256xf32>
    %11 = math.exp %10 : vector<8x256xf32>
    %cst_6 = arith.constant 1.000000e+00 : f32
    %12 = vector.broadcast %cst_6 : f32 to vector<8x256xf32>
    %13 = arith.addf %12, %11 : vector<8x256xf32>
    %14 = arith.divf %12, %13 : vector<8x256xf32>
    %15 = vector.extract_strided_slice %14 {offsets = [0, 0], sizes = [8, 128], strides = [1, 1]} : vector<8x256xf32> to vector<8x128xf32>
    %16 = vector.extract_strided_slice %14 {offsets = [0, 128], sizes = [8, 128], strides = [1, 1]} : vector<8x256xf32> to vector<8x128xf32>
    %17 = vector.extract_strided_slice %3 {offsets = [0, 256], sizes = [8, 128], strides = [1, 1]} : vector<8x384xf32> to vector<8x128xf32>
    %18 = vector.extract_strided_slice %6 {offsets = [0, 256], sizes = [8, 128], strides = [1, 1]} : vector<8x384xf32> to vector<8x128xf32>
    %19 = arith.mulf %15, %18 : vector<8x128xf32>
    %20 = arith.addf %17, %19 : vector<8x128xf32>
    %21 = math.tanh %20 : vector<8x128xf32>
    %cst_7 = arith.constant 1.000000e+00 : f32
    %22 = vector.broadcast %cst_7 : f32 to vector<8x128xf32>
    %23 = arith.subf %22, %16 : vector<8x128xf32>
    %24 = arith.mulf %23, %21 : vector<8x128xf32>
    %25 = arith.mulf %16, %2 : vector<8x128xf32>
    %26 = arith.addf %24, %25 : vector<8x128xf32>
    %c8 = arith.constant 8 : index
    %c0_8 = arith.constant 0 : index
    %27 = vector.load %arg1[%c8, %c0_8] : memref<48x384xf32, #tpu.memory_space<vmem>>, vector<8x384xf32>
    %cst_9 = arith.constant dense<0.000000e+00> : vector<8x384xf32>
    %28 = tpu.matmul %26, %0, %cst_9 {dimension_numbers = #tpu.dot_dimension_numbers<[1], [0], [0], [1], [0, 0, 1, 1], [], []>} : vector<8x128xf32>, vector<128x384xf32>, vector<8x384xf32> -> vector<8x384xf32>
    %29 = vector.broadcast %1 : vector<1x384xf32> to vector<8x384xf32>
    %30 = arith.addf %28, %29 : vector<8x384xf32>
    %31 = vector.extract_strided_slice %27 {offsets = [0, 0], sizes = [8, 256], strides = [1, 1]} : vector<8x384xf32> to vector<8x256xf32>
    %32 = vector.extract_strided_slice %30 {offsets = [0, 0], sizes = [8, 256], strides = [1, 1]} : vector<8x384xf32> to vector<8x256xf32>
    %33 = arith.addf %31, %32 : vector<8x256xf32>
    %34 = arith.negf %33 : vector<8x256xf32>
    %35 = math.exp %34 : vector<8x256xf32>
    %cst_10 = arith.constant 1.000000e+00 : f32
    %36 = vector.broadcast %cst_10 : f32 to vector<8x256xf32>
    %37 = arith.addf %36, %35 : vector<8x256xf32>
    %38 = arith.divf %36, %37 : vector<8x256xf32>
    %39 = vector.extract_strided_slice %38 {offsets = [0, 0], sizes = [8, 128], strides = [1, 1]} : vector<8x256xf32> to vector<8x128xf32>
    %40 = vector.extract_strided_slice %38 {offsets = [0, 128], sizes = [8, 128], strides = [1, 1]} : vector<8x256xf32> to vector<8x128xf32>
    %41 = vector.extract_strided_slice %27 {offsets = [0, 256], sizes = [8, 128], strides = [1, 1]} : vector<8x384xf32> to vector<8x128xf32>
    %42 = vector.extract_strided_slice %30 {offsets = [0, 256], sizes = [8, 128], strides = [1, 1]} : vector<8x384xf32> to vector<8x128xf32>
    %43 = arith.mulf %39, %42 : vector<8x128xf32>
    %44 = arith.addf %41, %43 : vector<8x128xf32>
    %45 = math.tanh %44 : vector<8x128xf32>
    %cst_11 = arith.constant 1.000000e+00 : f32
    %46 = vector.broadcast %cst_11 : f32 to vector<8x128xf32>
    %47 = arith.subf %46, %40 : vector<8x128xf32>
    %48 = arith.mulf %47, %45 : vector<8x128xf32>
    %49 = arith.mulf %40, %26 : vector<8x128xf32>
    %50 = arith.addf %48, %49 : vector<8x128xf32>
    %c16 = arith.constant 16 : index
    %c0_12 = arith.constant 0 : index
    %51 = vector.load %arg1[%c16, %c0_12] : memref<48x384xf32, #tpu.memory_space<vmem>>, vector<8x384xf32>
    %cst_13 = arith.constant dense<0.000000e+00> : vector<8x384xf32>
    %52 = tpu.matmul %50, %0, %cst_13 {dimension_numbers = #tpu.dot_dimension_numbers<[1], [0], [0], [1], [0, 0, 1, 1], [], []>} : vector<8x128xf32>, vector<128x384xf32>, vector<8x384xf32> -> vector<8x384xf32>
    %53 = vector.broadcast %1 : vector<1x384xf32> to vector<8x384xf32>
    %54 = arith.addf %52, %53 : vector<8x384xf32>
    %55 = vector.extract_strided_slice %51 {offsets = [0, 0], sizes = [8, 256], strides = [1, 1]} : vector<8x384xf32> to vector<8x256xf32>
    %56 = vector.extract_strided_slice %54 {offsets = [0, 0], sizes = [8, 256], strides = [1, 1]} : vector<8x384xf32> to vector<8x256xf32>
    %57 = arith.addf %55, %56 : vector<8x256xf32>
    %58 = arith.negf %57 : vector<8x256xf32>
    %59 = math.exp %58 : vector<8x256xf32>
    %cst_14 = arith.constant 1.000000e+00 : f32
    %60 = vector.broadcast %cst_14 : f32 to vector<8x256xf32>
    %61 = arith.addf %60, %59 : vector<8x256xf32>
    %62 = arith.divf %60, %61 : vector<8x256xf32>
    %63 = vector.extract_strided_slice %62 {offsets = [0, 0], sizes = [8, 128], strides = [1, 1]} : vector<8x256xf32> to vector<8x128xf32>
    %64 = vector.extract_strided_slice %62 {offsets = [0, 128], sizes = [8, 128], strides = [1, 1]} : vector<8x256xf32> to vector<8x128xf32>
    %65 = vector.extract_strided_slice %51 {offsets = [0, 256], sizes = [8, 128], strides = [1, 1]} : vector<8x384xf32> to vector<8x128xf32>
    %66 = vector.extract_strided_slice %54 {offsets = [0, 256], sizes = [8, 128], strides = [1, 1]} : vector<8x384xf32> to vector<8x128xf32>
    %67 = arith.mulf %63, %66 : vector<8x128xf32>
    %68 = arith.addf %65, %67 : vector<8x128xf32>
    %69 = math.tanh %68 : vector<8x128xf32>
    %cst_15 = arith.constant 1.000000e+00 : f32
    %70 = vector.broadcast %cst_15 : f32 to vector<8x128xf32>
    %71 = arith.subf %70, %64 : vector<8x128xf32>
    %72 = arith.mulf %71, %69 : vector<8x128xf32>
    %73 = arith.mulf %64, %50 : vector<8x128xf32>
    %74 = arith.addf %72, %73 : vector<8x128xf32>
    %c24 = arith.constant 24 : index
    %c0_16 = arith.constant 0 : index
    %75 = vector.load %arg1[%c24, %c0_16] : memref<48x384xf32, #tpu.memory_space<vmem>>, vector<8x384xf32>
    %cst_17 = arith.constant dense<0.000000e+00> : vector<8x384xf32>
    %76 = tpu.matmul %74, %0, %cst_17 {dimension_numbers = #tpu.dot_dimension_numbers<[1], [0], [0], [1], [0, 0, 1, 1], [], []>} : vector<8x128xf32>, vector<128x384xf32>, vector<8x384xf32> -> vector<8x384xf32>
    %77 = vector.broadcast %1 : vector<1x384xf32> to vector<8x384xf32>
    %78 = arith.addf %76, %77 : vector<8x384xf32>
    %79 = vector.extract_strided_slice %75 {offsets = [0, 0], sizes = [8, 256], strides = [1, 1]} : vector<8x384xf32> to vector<8x256xf32>
    %80 = vector.extract_strided_slice %78 {offsets = [0, 0], sizes = [8, 256], strides = [1, 1]} : vector<8x384xf32> to vector<8x256xf32>
    %81 = arith.addf %79, %80 : vector<8x256xf32>
    %82 = arith.negf %81 : vector<8x256xf32>
    %83 = math.exp %82 : vector<8x256xf32>
    %cst_18 = arith.constant 1.000000e+00 : f32
    %84 = vector.broadcast %cst_18 : f32 to vector<8x256xf32>
    %85 = arith.addf %84, %83 : vector<8x256xf32>
    %86 = arith.divf %84, %85 : vector<8x256xf32>
    %87 = vector.extract_strided_slice %86 {offsets = [0, 0], sizes = [8, 128], strides = [1, 1]} : vector<8x256xf32> to vector<8x128xf32>
    %88 = vector.extract_strided_slice %86 {offsets = [0, 128], sizes = [8, 128], strides = [1, 1]} : vector<8x256xf32> to vector<8x128xf32>
    %89 = vector.extract_strided_slice %75 {offsets = [0, 256], sizes = [8, 128], strides = [1, 1]} : vector<8x384xf32> to vector<8x128xf32>
    %90 = vector.extract_strided_slice %78 {offsets = [0, 256], sizes = [8, 128], strides = [1, 1]} : vector<8x384xf32> to vector<8x128xf32>
    %91 = arith.mulf %87, %90 : vector<8x128xf32>
    %92 = arith.addf %89, %91 : vector<8x128xf32>
    %93 = math.tanh %92 : vector<8x128xf32>
    %cst_19 = arith.constant 1.000000e+00 : f32
    %94 = vector.broadcast %cst_19 : f32 to vector<8x128xf32>
    %95 = arith.subf %94, %88 : vector<8x128xf32>
    %96 = arith.mulf %95, %93 : vector<8x128xf32>
    %97 = arith.mulf %88, %74 : vector<8x128xf32>
    %98 = arith.addf %96, %97 : vector<8x128xf32>
    %c32 = arith.constant 32 : index
    %c0_20 = arith.constant 0 : index
    %99 = vector.load %arg1[%c32, %c0_20] : memref<48x384xf32, #tpu.memory_space<vmem>>, vector<8x384xf32>
    %cst_21 = arith.constant dense<0.000000e+00> : vector<8x384xf32>
    %100 = tpu.matmul %98, %0, %cst_21 {dimension_numbers = #tpu.dot_dimension_numbers<[1], [0], [0], [1], [0, 0, 1, 1], [], []>} : vector<8x128xf32>, vector<128x384xf32>, vector<8x384xf32> -> vector<8x384xf32>
    %101 = vector.broadcast %1 : vector<1x384xf32> to vector<8x384xf32>
    %102 = arith.addf %100, %101 : vector<8x384xf32>
    %103 = vector.extract_strided_slice %99 {offsets = [0, 0], sizes = [8, 256], strides = [1, 1]} : vector<8x384xf32> to vector<8x256xf32>
    %104 = vector.extract_strided_slice %102 {offsets = [0, 0], sizes = [8, 256], strides = [1, 1]} : vector<8x384xf32> to vector<8x256xf32>
    %105 = arith.addf %103, %104 : vector<8x256xf32>
    %106 = arith.negf %105 : vector<8x256xf32>
    %107 = math.exp %106 : vector<8x256xf32>
    %cst_22 = arith.constant 1.000000e+00 : f32
    %108 = vector.broadcast %cst_22 : f32 to vector<8x256xf32>
    %109 = arith.addf %108, %107 : vector<8x256xf32>
    %110 = arith.divf %108, %109 : vector<8x256xf32>
    %111 = vector.extract_strided_slice %110 {offsets = [0, 0], sizes = [8, 128], strides = [1, 1]} : vector<8x256xf32> to vector<8x128xf32>
    %112 = vector.extract_strided_slice %110 {offsets = [0, 128], sizes = [8, 128], strides = [1, 1]} : vector<8x256xf32> to vector<8x128xf32>
    %113 = vector.extract_strided_slice %99 {offsets = [0, 256], sizes = [8, 128], strides = [1, 1]} : vector<8x384xf32> to vector<8x128xf32>
    %114 = vector.extract_strided_slice %102 {offsets = [0, 256], sizes = [8, 128], strides = [1, 1]} : vector<8x384xf32> to vector<8x128xf32>
    %115 = arith.mulf %111, %114 : vector<8x128xf32>
    %116 = arith.addf %113, %115 : vector<8x128xf32>
    %117 = math.tanh %116 : vector<8x128xf32>
    %cst_23 = arith.constant 1.000000e+00 : f32
    %118 = vector.broadcast %cst_23 : f32 to vector<8x128xf32>
    %119 = arith.subf %118, %112 : vector<8x128xf32>
    %120 = arith.mulf %119, %117 : vector<8x128xf32>
    %121 = arith.mulf %112, %98 : vector<8x128xf32>
    %122 = arith.addf %120, %121 : vector<8x128xf32>
    %c40 = arith.constant 40 : index
    %c0_24 = arith.constant 0 : index
    %123 = vector.load %arg1[%c40, %c0_24] : memref<48x384xf32, #tpu.memory_space<vmem>>, vector<8x384xf32>
    %cst_25 = arith.constant dense<0.000000e+00> : vector<8x384xf32>
    %124 = tpu.matmul %122, %0, %cst_25 {dimension_numbers = #tpu.dot_dimension_numbers<[1], [0], [0], [1], [0, 0, 1, 1], [], []>} : vector<8x128xf32>, vector<128x384xf32>, vector<8x384xf32> -> vector<8x384xf32>
    %125 = vector.broadcast %1 : vector<1x384xf32> to vector<8x384xf32>
    %126 = arith.addf %124, %125 : vector<8x384xf32>
    %127 = vector.extract_strided_slice %123 {offsets = [0, 0], sizes = [8, 256], strides = [1, 1]} : vector<8x384xf32> to vector<8x256xf32>
    %128 = vector.extract_strided_slice %126 {offsets = [0, 0], sizes = [8, 256], strides = [1, 1]} : vector<8x384xf32> to vector<8x256xf32>
    %129 = arith.addf %127, %128 : vector<8x256xf32>
    %130 = arith.negf %129 : vector<8x256xf32>
    %131 = math.exp %130 : vector<8x256xf32>
    %cst_26 = arith.constant 1.000000e+00 : f32
    %132 = vector.broadcast %cst_26 : f32 to vector<8x256xf32>
    %133 = arith.addf %132, %131 : vector<8x256xf32>
    %134 = arith.divf %132, %133 : vector<8x256xf32>
    %135 = vector.extract_strided_slice %134 {offsets = [0, 0], sizes = [8, 128], strides = [1, 1]} : vector<8x256xf32> to vector<8x128xf32>
    %136 = vector.extract_strided_slice %134 {offsets = [0, 128], sizes = [8, 128], strides = [1, 1]} : vector<8x256xf32> to vector<8x128xf32>
    %137 = vector.extract_strided_slice %123 {offsets = [0, 256], sizes = [8, 128], strides = [1, 1]} : vector<8x384xf32> to vector<8x128xf32>
    %138 = vector.extract_strided_slice %126 {offsets = [0, 256], sizes = [8, 128], strides = [1, 1]} : vector<8x384xf32> to vector<8x128xf32>
    %139 = arith.mulf %135, %138 : vector<8x128xf32>
    %140 = arith.addf %137, %139 : vector<8x128xf32>
    %141 = math.tanh %140 : vector<8x128xf32>
    %cst_27 = arith.constant 1.000000e+00 : f32
    %142 = vector.broadcast %cst_27 : f32 to vector<8x128xf32>
    %143 = arith.subf %142, %136 : vector<8x128xf32>
    %144 = arith.mulf %143, %141 : vector<8x128xf32>
    %145 = arith.mulf %136, %122 : vector<8x128xf32>
    %146 = arith.addf %144, %145 : vector<8x128xf32>
    %147 = tpu.concatenate %26, %50, %74, %98, %122, %146 in 0 : vector<8x128xf32>, vector<8x128xf32>, vector<8x128xf32>, vector<8x128xf32>, vector<8x128xf32>, vector<8x128xf32> -> vector<48x128xf32>
    %c0_28 = arith.constant 0 : index
    %c0_29 = arith.constant 0 : index
    %148 = vector.load %arg5[%c0_28, %c0_29] : memref<128x64xf32, #tpu.memory_space<vmem>>, vector<128x64xf32>
    %cst_30 = arith.constant dense<0.000000e+00> : vector<48x64xf32>
    %149 = tpu.matmul %147, %148, %cst_30 {dimension_numbers = #tpu.dot_dimension_numbers<[1], [0], [0], [1], [0, 0, 1, 1], [], []>} : vector<48x128xf32>, vector<128x64xf32>, vector<48x64xf32> -> vector<48x64xf32>
    %c0_31 = arith.constant 0 : index
    %c0_32 = arith.constant 0 : index
    %150 = vector.load %arg6[%c0_31, %c0_32] : memref<1x64xf32, #tpu.memory_space<vmem>>, vector<1x64xf32>
    %151 = vector.broadcast %150 : vector<1x64xf32> to vector<48x64xf32>
    %152 = arith.addf %149, %151 : vector<48x64xf32>
    %153 = math.tanh %152 : vector<48x64xf32>
    %c0_33 = arith.constant 0 : index
    %c0_34 = arith.constant 0 : index
    %154 = vector.load %arg2[%c0_33, %c0_34] : memref<48x64xf32, #tpu.memory_space<vmem>>, vector<48x64xf32>
    %155 = arith.mulf %153, %154 : vector<48x64xf32>
    %156 = vector.extract_strided_slice %155 {offsets = [0, 0], sizes = [8, 64], strides = [1, 1]} : vector<48x64xf32> to vector<8x64xf32>
    %157 = vector.extract_strided_slice %155 {offsets = [8, 0], sizes = [8, 64], strides = [1, 1]} : vector<48x64xf32> to vector<8x64xf32>
    %158 = arith.addf %156, %157 : vector<8x64xf32>
    %159 = vector.extract_strided_slice %155 {offsets = [16, 0], sizes = [8, 64], strides = [1, 1]} : vector<48x64xf32> to vector<8x64xf32>
    %160 = arith.addf %158, %159 : vector<8x64xf32>
    %161 = vector.extract_strided_slice %155 {offsets = [24, 0], sizes = [8, 64], strides = [1, 1]} : vector<48x64xf32> to vector<8x64xf32>
    %162 = arith.addf %160, %161 : vector<8x64xf32>
    %163 = vector.extract_strided_slice %155 {offsets = [32, 0], sizes = [8, 64], strides = [1, 1]} : vector<48x64xf32> to vector<8x64xf32>
    %164 = arith.addf %162, %163 : vector<8x64xf32>
    %165 = vector.extract_strided_slice %155 {offsets = [40, 0], sizes = [8, 64], strides = [1, 1]} : vector<48x64xf32> to vector<8x64xf32>
    %166 = arith.addf %164, %165 : vector<8x64xf32>
    %c0_35 = arith.constant 0 : index
    %c0_36 = arith.constant 0 : index
    %167 = vector.load %arg7[%c0_35, %c0_36] : memref<64x128xf32, #tpu.memory_space<vmem>>, vector<64x128xf32>
    %cst_37 = arith.constant dense<0.000000e+00> : vector<8x128xf32>
    %168 = tpu.matmul %166, %167, %cst_37 {dimension_numbers = #tpu.dot_dimension_numbers<[1], [0], [0], [1], [0, 0, 1, 1], [], []>} : vector<8x64xf32>, vector<64x128xf32>, vector<8x128xf32> -> vector<8x128xf32>
    %c0_38 = arith.constant 0 : index
    %c0_39 = arith.constant 0 : index
    %169 = vector.load %arg8[%c0_38, %c0_39] : memref<1x128xf32, #tpu.memory_space<vmem>>, vector<1x128xf32>
    %170 = vector.broadcast %169 : vector<1x128xf32> to vector<8x128xf32>
    %171 = arith.addf %168, %170 : vector<8x128xf32>
    %c0_40 = arith.constant 0 : index
    %c0_41 = arith.constant 0 : index
    %172 = vector.load %arg9[%c0_40, %c0_41] : memref<8x128xf32, #tpu.memory_space<vmem>>, vector<8x128xf32>
    tpu.vector_store %arg9[%c0_40, %c0_41], %171 {strides = array<i32>} : memref<8x128xf32, #tpu.memory_space<vmem>>, vector<8x128xf32>,
    return
  }
  func.func @transform_0(%arg0: i32) -> (i32, i32) {
    %c0_i32 = arith.constant 0 : i32
    %c0_i32_0 = arith.constant 0 : i32
    return %arg0, %c0_i32 : i32, i32
  }
  func.func @transform_1(%arg0: i32) -> (i32, i32) {
    %c0_i32 = arith.constant 0 : i32
    %c0_i32_0 = arith.constant 0 : i32
    return %arg0, %c0_i32 : i32, i32
  }
  func.func @transform_2(%arg0: i32) -> (i32, i32) {
    %c0_i32 = arith.constant 0 : i32
    %c0_i32_0 = arith.constant 0 : i32
    %c0_i32_1 = arith.constant 0 : i32
    return %c0_i32, %c0_i32_0 : i32, i32
  }
  func.func @transform_3(%arg0: i32) -> (i32, i32) {
    %c0_i32 = arith.constant 0 : i32
    %c0_i32_0 = arith.constant 0 : i32
    %c0_i32_1 = arith.constant 0 : i32
    return %c0_i32, %c0_i32_0 : i32, i32
  }
  func.func @transform_4(%arg0: i32) -> (i32, i32) {
    %c0_i32 = arith.constant 0 : i32
    %c0_i32_0 = arith.constant 0 : i32
    %c0_i32_1 = arith.constant 0 : i32
    return %c0_i32, %c0_i32_0 : i32, i32
  }
  func.func @transform_5(%arg0: i32) -> (i32, i32) {
    %c0_i32 = arith.constant 0 : i32
    %c0_i32_0 = arith.constant 0 : i32
    %c0_i32_1 = arith.constant 0 : i32
    return %c0_i32, %c0_i32_0 : i32, i32
  }
  func.func @transform_6(%arg0: i32) -> (i32, i32) {
    %c0_i32 = arith.constant 0 : i32
    %c0_i32_0 = arith.constant 0 : i32
    %c0_i32_1 = arith.constant 0 : i32
    return %c0_i32, %c0_i32_0 : i32, i32
  }
  func.func @transform_7(%arg0: i32) -> (i32, i32) {
    %c0_i32 = arith.constant 0 : i32
    %c0_i32_0 = arith.constant 0 : i32
    %c0_i32_1 = arith.constant 0 : i32
    return %c0_i32, %c0_i32_0 : i32, i32
  }
  func.func @transform_8(%arg0: i32) -> (i32, i32) {
    %c0_i32 = arith.constant 0 : i32
    %c0_i32_0 = arith.constant 0 : i32
    return %arg0, %c0_i32 : i32, i32
  }
}

</mosaic_0001>

<bundles_post_ra>
// kernel: tpu_custom_call.1
= control target key start
LH: loop header
LB: loop body
LE: loop exit
PB: predicated region body
PF: predicated region fallthrough
CT: control target
= control target key end

     0   :  { %13 = vsyncpa [#allocation3], 0  ;;  %s2681_s0 = inlined_call_operand.vmem [shape: f32[48,384], index: 0, kind: input, shape index: {}]   ;;  %s2682_s1 = inlined_call_operand.vmem [shape: f32[48,64], index: 1, kind: input, shape index: {}]   ;;  %s2683_s2 = inlined_call_operand.hbm [shape: f32[128,384], index: 2, kind: input, shape index: {}]   ;;  %s2684_s3 = inlined_call_operand.vmem [shape: f32[1,384], index: 3, kind: input, shape index: {}]   ;;  %s2685_s4 = inlined_call_operand.vmem [shape: f32[128,64], index: 4, kind: input, shape index: {}]   ;;  %s2686_s5 = inlined_call_operand.vmem [shape: f32[1,64], index: 5, kind: input, shape index: {}]   ;;  %s2687_s6 = inlined_call_operand.hbm [shape: f32[64,128], index: 6, kind: input, shape index: {}]   ;;  %s2688_s7 = inlined_call_operand.vmem [shape: f32[1,128], index: 7, kind: input, shape index: {}]   ;;  %s2689_s8 = inlined_call_operand.hbm [shape: f32[8,128], index: 8, kind: output, shape index: {}]  }
   0x1   :  { %14 = vsyncpa [#allocation6], 0 }
   0x2   :  { %15 = vsyncpa [#allocation4], 0  ;;  %s1945_s27 = smov [#allocation2]  }
   0x3   :  { %s25_s28 = sshll.u32 %s1945_s27, 4  ;;  %s26_s28 = int_to_ptr.vmem [resolvable:$true] %s25_s28 }
   0x4   :  { %s1887_s29 = scalar_lea.vmem %s26_s28, 6144  ;;  %p1892_p1 = scmp.lt.s32.totalorder %s26_s28, %s26_s28 }
   0x5   :  { %p1888_p0 = scmp.ne.s32.totalorder %s26_s28, %s1887_s29  ;;  %p1893_p2 = scmp.lt.s32.totalorder %s1887_s29, %s1887_s29 }
   0x7   :  { %p1894_p3 = por %p1893_p2, %p1892_p1 }
   0x9   :  { %p1895_p4 = pnand %p1894_p3, %p1888_p0 }
   0xb   :  { %1898 = shalt.err (!%p1895_p4)
}
   0xc   :  { %s1946_s30 = smov 384   ;;  %s1947_s9 = smov 24  }
   0xd   :  { %31 = dma.hbm_to_vmem [thread:$0]  %s2683_s2, 6144, %s26_s28, [#allocation3], %s1946_s30, %s1946_s30, %s1947_s9  }
   0xe   :  { %s1948_s12 = smov [#allocation5]  }
   0xf   :  { %s43_s13 = sshll.u32 %s1948_s12, 4  ;;  %s44_s13 = int_to_ptr.vmem [resolvable:$true] %s43_s13 }
  0x10   :  { %s1907_s14 = scalar_lea.vmem %s44_s13, 1024  ;;  %p1912_p6 = scmp.lt.s32.totalorder %s44_s13, %s44_s13 }
  0x11   :  { %p1908_p5 = scmp.ne.s32.totalorder %s44_s13, %s1907_s14  ;;  %p1913_p7 = scmp.lt.s32.totalorder %s1907_s14, %s1907_s14 }
  0x13   :  { %p1914_p8 = por %p1913_p7, %p1912_p6 }
  0x15   :  { %p1915_p9 = pnand %p1914_p8, %p1908_p5 }
  0x17   :  { %1918 = shalt.err (!%p1915_p9)
}
  0x18   :  { %s1949_s15 = smov 128   ;;  %s1950_s16 = smov 8  }
  0x19   :  { %49 = dma.hbm_to_vmem [thread:$0]  %s2687_s6, 1024, %s44_s13, [#allocation6], %s1949_s15, %s1949_s15, %s1950_s16  }
  0x1a   :  { %1939 = dma.done.wait [#allocation3], 6144  }
  0x1b   :  { %1940 = vsyncadd [#allocation3], 4294961152 }
  0x1c   :  { %1941 = dma.done.wait [#allocation6], 1024  }
  0x1d   :  { %1942 = vsyncadd [#allocation6], 4294966272  ;;  %v2690_v0 = vmov 0.0   ;;  %vm1952_vm0 = vmmov 0   ;;  %v2009_v1 = vld [vmem:[#allocation2 + $0x170] sm:$0xff]  ;;  %v2011_v2 = vld [vmem:[#allocation2 + $0x168] sm:$0xff]  ;;  %v111_v49 = vlaneseq }
  0x1e   :  { %190 = vmatprep.mubr.f32.mxu0 %v2690_v0  ;;  %1508 = vmatprep.subr.mxu1 %v2690_v0  ;;  %2703 = vst [vmem:[#allocation11_spill] sm:$0xff] %v2009_v1  ;;  %v2013_v3 = vld [vmem:[#allocation2 + $0x158] sm:$0xff]  ;;  %v2016_v4 = vld [vmem:[#allocation2 + $0x150] sm:$0xff]  ;;  %v2019_v5 = vld [vmem:[#allocation2 + $0x140] sm:$0xff]  ;;  %vm1269_vm1 = vcmask 523264   ;;  %s1953_s24 = smov [#allocation7]  }
  0x1f   :  { %1540 = vmatprep.mubr.msk.f32.mxu1 %vm1952_vm0, %v2690_v0  ;;  %126 = vmatprep.subr.mxu0 %v2009_v1  ;;  %v2022_v6 = vld [vmem:[#allocation2 + $0x138] sm:$0xff]  ;;  %v2025_v7 = vld [vmem:[#allocation2 + $0x128] sm:$0xff]  ;;  %v2028_v8 = vld [vmem:[#allocation2 + $0x120] sm:$0xff]  ;;  %v112_v50 = vshrl.u32 %v111_v49, 7  ;;  %s1350_s25 = sshll.u32 %s1953_s24, 4  ;;  %s1351_s25 = int_to_ptr.vmem [resolvable:$true] %s1350_s25 }
  0x20   :  { %127 = vmatpush1.msra.mxu0 %v2011_v2  ;;  %v2031_v9 = vld [vmem:[#allocation2 + $0x110] sm:$0xff]  ;;  %v2034_v10 = vld [vmem:[#allocation2 + $0x108] sm:$0xff]  ;;  %v2037_v11 = vld [vmem:[#allocation2 + $0xf8] sm:$0xff]  ;;  %s1919_s26 = scalar_lea.vmem %s1351_s25, 128  ;;  %p1924_p11 = scmp.lt.s32.totalorder %s1351_s25, %s1351_s25 }
  0x21   :  { %128 = vmatprep.subr.mxu0 %v2013_v3  ;;  %v2040_v12 = vld [vmem:[#allocation2 + $0xf0] sm:$0xff]  ;;  %v2043_v13 = vld [vmem:[#allocation2 + $0xe0] sm:$0xff]  ;;  %v2045_v14 = vld [vmem:[#allocation2 + $0x178] sm:$0xff]  ;;  %v113_v51 = vsub.s32 0, %v112_v50  ;;  %v117_v54 = vsub.s32 1, %v112_v50  ;;  %p1920_p10 = scmp.ne.s32.totalorder %s1351_s25, %s1919_s26  ;;  %p1925_p12 = scmp.lt.s32.totalorder %s1919_s26, %s1919_s26 }
  0x22   :  { %129 = vmatpush1.msra.mxu0 %v2016_v4  ;;  %v2048_v15 = vld [vmem:[#allocation2 + $0xd8] sm:$0xff]  ;;  %1509 = vmatpush3.msra.mxu1 %v2045_v14  ;;  %v2051_v16 = vld [vmem:[#allocation2 + $0x160] sm:$0xff]  ;;  %v2054_v17 = vld [vmem:[#allocation2 + $0xc8] sm:$0xff] }
  0x23   :  { %130 = vmatprep.subr.mxu0 %v2019_v5  ;;  %1510 = vmatprep.subr.mxu1 %v2690_v0  ;;  %v2057_v18 = vld [vmem:[#allocation2 + $0x148] sm:$0xff]  ;;  %v2060_v19 = vld [vmem:[#allocation2 + $0xc0] sm:$0xff]  ;;  %v2064_v20 = vld [vmem:[#allocation2 + $0xb0] sm:$0xff]  ;;  %p1926_p13 = por %p1925_p12, %p1924_p11 }
  0x24   :  { %131 = vmatpush1.msra.mxu0 %v2022_v6  ;;  %1511 = vmatpush3.msra.mxu1 %v2051_v16  ;;  %v2067_v21 = vld [vmem:[#allocation2 + $0x130] sm:$0xff]  ;;  %v2070_v22 = vld [vmem:[#allocation2 + $0xa8] sm:$0xff]  ;;  %v2074_v23 = vld [vmem:[#allocation2 + $0x98] sm:$0xff] }
  0x25   :  { %132 = vmatprep.subr.mxu0 %v2025_v7  ;;  %1512 = vmatprep.subr.mxu1 %v2690_v0  ;;  %v2077_v24 = vld [vmem:[#allocation2 + $0x118] sm:$0xff]  ;;  %v2080_v25 = vld [vmem:[#allocation2 + $0x90] sm:$0xff]  ;;  %v2084_v26 = vld [vmem:[#allocation2 + $0x80] sm:$0xff]  ;;  %p1927_p0 = pnand %p1926_p13, %p1920_p10 }
  0x26   :  { %133 = vmatpush1.msra.mxu0 %v2028_v8  ;;  %1513 = vmatpush3.msra.mxu1 %v2057_v18  ;;  %v2087_v27 = vld [vmem:[#allocation2 + $0x100] sm:$0xff]  ;;  %v2090_v28 = vld [vmem:[#allocation2 + $0x78] sm:$0xff]  ;;  %v2094_v29 = vld [vmem:[#allocation2 + $0x68] sm:$0xff] }
  0x27   :  { %134 = vmatprep.subr.mxu0 %v2031_v9  ;;  %1514 = vmatprep.subr.mxu1 %v2690_v0  ;;  %v2097_v30 = vld [vmem:[#allocation2 + $0xe8] sm:$0xff]  ;;  %v2100_v31 = vld [vmem:[#allocation2 + $0x60] sm:$0xff]  ;;  %v2104_v32 = vld [vmem:[#allocation2 + $0x50] sm:$0xff] }
  0x28   :  { %135 = vmatpush1.msra.mxu0 %v2034_v10  ;;  %1515 = vmatpush3.msra.mxu1 %v2067_v21  ;;  %v2107_v33 = vld [vmem:[#allocation2 + $0xd0] sm:$0xff]  ;;  %v2110_v34 = vld [vmem:[#allocation2 + $0x48] sm:$0xff]  ;;  %v2114_v35 = vld [vmem:[#allocation2 + $0x38] sm:$0xff] }
  0x29   :  { %136 = vmatprep.subr.mxu0 %v2037_v11  ;;  %1516 = vmatprep.subr.mxu1 %v2690_v0  ;;  %v2117_v36 = vld [vmem:[#allocation2 + $0xb8] sm:$0xff]  ;;  %v2120_v37 = vld [vmem:[#allocation2 + $0x30] sm:$0xff]  ;;  %v2124_v38 = vld [vmem:[#allocation2 + $0x20] sm:$0xff] }
  0x2a   :  { %137 = vmatpush1.msra.mxu0 %v2040_v12  ;;  %1517 = vmatpush3.msra.mxu1 %v2077_v24  ;;  %v2127_v39 = vld [vmem:[#allocation2 + $0xa0] sm:$0xff]  ;;  %v2130_v40 = vld [vmem:[#allocation2 + $0x18] sm:$0xff]  ;;  %v2134_v41 = vld [vmem:[#allocation2 + $0x8] sm:$0xff] }
  0x2b   :  { %138 = vmatprep.subr.mxu0 %v2043_v13  ;;  %1518 = vmatprep.subr.mxu1 %v2690_v0  ;;  %2704 = vst [vmem:[#allocation12_spill] sm:$0xff] %v2134_v41  ;;  %v2137_v42 = vld [vmem:[#allocation2 + $0x88] sm:$0xff]  ;;  %v2140_v43 = vld [vmem:[#allocation2] sm:$0xff]  ;;  %v2145_v44 = vld [vmem:[#allocation2 + $0x70] sm:$0xff] }
  0x2c   :  { %139 = vmatpush1.msra.mxu0 %v2048_v15  ;;  %1519 = vmatpush3.msra.mxu1 %v2087_v27  ;;  %2705 = vst [vmem:[#allocation13_spill] sm:$0xff] %v2140_v43  ;;  %v2151_v45 = vld [vmem:[#allocation2 + $0x58] sm:$0xff]  ;;  %v2156_v46 = vld [vmem:[#allocation2 + $0x40] sm:$0xff]  ;;  %v2162_v47 = vld [vmem:[#allocation2 + $0x28] sm:$0xff] }
  0x2d   :  { %140 = vmatprep.subr.mxu0 %v2054_v17  ;;  %1520 = vmatprep.subr.mxu1 %v2690_v0  ;;  %2706 = vst [vmem:[#allocation14_spill] sm:$0xff] %v2162_v47  ;;  %v2168_v48 = vld [vmem:[#allocation2 + $0x10] sm:$0xff]  ;;  %v106_v52 = vld [vmem:[%s2684_s3] sm:$0x7]  ;;  %v108_v63 = vld [vmem:[%s2681_s0 + $0x8] sm:$0xff] }
  0x2e   :  { %141 = vmatpush1.msra.mxu0 %v2060_v19  ;;  %1521 = vmatpush3.msra.mxu1 %v2097_v30  ;;  %2707 = vst [vmem:[#allocation15_spill] sm:$0xff] %v2168_v48  ;;  %v2242_v53 = vrot.slane %v106_v52, %v113_v51  ;;  %v107_v55 = vld [vmem:[%s2681_s0] sm:$0xff]  ;;  %v2248_v58 = vrot.slane %v106_v52, %v117_v54  ;;  %v121_v54 = vsub.s32 2, %v112_v50 }
  0x2f   :  { %142 = vmatprep.subr.mxu0 %v2064_v20  ;;  %1522 = vmatprep.subr.mxu1 %v2690_v0 }
  0x30   :  { %143 = vmatpush1.msra.mxu0 %v2070_v22  ;;  %1523 = vmatpush3.msra.mxu1 %v2107_v33 }
  0x31   :  { %144 = vmatprep.subr.mxu0 %v2074_v23  ;;  %1524 = vmatprep.subr.mxu1 %v2690_v0 }
  0x32   :  { %145 = vmatpush1.msra.mxu0 %v2080_v25  ;;  %1525 = vmatpush3.msra.mxu1 %v2117_v36 }
  0x33   :  { %146 = vmatprep.subr.mxu0 %v2084_v26  ;;  %1526 = vmatprep.subr.mxu1 %v2690_v0 }
  0x34   :  { %147 = vmatpush1.msra.mxu0 %v2090_v28  ;;  %1527 = vmatpush3.msra.mxu1 %v2127_v39 }
  0x35   :  { %148 = vmatprep.subr.mxu0 %v2094_v29  ;;  %1528 = vmatprep.subr.mxu1 %v2690_v0 }
  0x36   :  { %149 = vmatpush1.msra.mxu0 %v2100_v31  ;;  %1529 = vmatpush3.msra.mxu1 %v2137_v42 }
  0x37   :  { %150 = vmatprep.subr.mxu0 %v2104_v32  ;;  %1530 = vmatprep.subr.mxu1 %v2690_v0 }
  0x38   :  { %151 = vmatpush1.msra.mxu0 %v2110_v34  ;;  %1531 = vmatpush3.msra.mxu1 %v2145_v44 }
  0x39   :  { %152 = vmatprep.subr.mxu0 %v2114_v35  ;;  %1532 = vmatprep.subr.mxu1 %v2690_v0 }
  0x3a   :  { %153 = vmatpush1.msra.mxu0 %v2120_v37  ;;  %1533 = vmatpush3.msra.mxu1 %v2151_v45 }
  0x3b   :  { %154 = vmatprep.subr.mxu0 %v2124_v38  ;;  %1534 = vmatprep.subr.mxu1 %v2690_v0 }
  0x3c   :  { %155 = vmatpush1.msra.mxu0 %v2130_v40  ;;  %1535 = vmatpush3.msra.mxu1 %v2156_v46 }
  0x3d   :  { %156 = vmatprep.subr.mxu0 %v2134_v41  ;;  %1536 = vmatprep.subr.mxu1 %v2690_v0 }
  0x3e   :  { %157 = vmatpush1.msra.mxu0 %v2140_v43  ;;  %1537 = vmatpush3.msra.mxu1 %v2162_v47 }
  0x3f   :  { %191 = vmatmul.mubr.f32.vlgmr.msra.gmra.mxu0 %v2690_v0  ;;  %291 = vmatprep.subr.mxu0 %v2009_v1 }
  0x40   :  { %292 = vmatpush1.msra.mxu0 %v2011_v2  ;;  %1538 = vmatprep.subr.mxu1 %v2690_v0 }
  0x41   :  { %293 = vmatprep.subr.mxu0 %v2013_v3  ;;  %1539 = vmatpush3.msra.mxu1 %v2168_v48 }
  0x42   :  { %294 = vmatpush1.msra.mxu0 %v2016_v4  ;;  %1541 = vmatmul.mubr.f32.vlgmr.msra.gmra.mxu1 %v2690_v0 }
  0x43   :  { %295 = vmatprep.subr.mxu0 %v2019_v5  ;;  %1543 = vmatprep.subr.mxu1 %v2690_v0 }
  0x44   :  { %296 = vmatpush1.msra.mxu0 %v2022_v6  ;;  %1544 = vmatpush3.msra.mxu1 %v2045_v14 }
  0x45   :  { %297 = vmatprep.subr.mxu0 %v2025_v7  ;;  %1545 = vmatprep.subr.mxu1 %v2690_v0 }
  0x46   :  { %298 = vmatpush1.msra.mxu0 %v2028_v8  ;;  %1546 = vmatpush3.msra.mxu1 %v2051_v16 }
  0x47   :  { %299 = vmatprep.subr.mxu0 %v2031_v9  ;;  %1547 = vmatprep.subr.mxu1 %v2690_v0 }
  0x48   :  { %300 = vmatpush1.msra.mxu0 %v2034_v10  ;;  %1548 = vmatpush3.msra.mxu1 %v2057_v18 }
  0x49   :  { %301 = vmatprep.subr.mxu0 %v2037_v11  ;;  %1549 = vmatprep.subr.mxu1 %v2690_v0 }
  0x4a   :  { %302 = vmatpush1.msra.mxu0 %v2040_v12  ;;  %1550 = vmatpush3.msra.mxu1 %v2067_v21 }
  0x4b   :  { %303 = vmatprep.subr.mxu0 %v2043_v13  ;;  %1551 = vmatprep.subr.mxu1 %v2690_v0 }
  0x4c   :  { %304 = vmatpush1.msra.mxu0 %v2048_v15  ;;  %1552 = vmatpush3.msra.mxu1 %v2077_v24 }
  0x4d   :  { %305 = vmatprep.subr.mxu0 %v2054_v17  ;;  %1553 = vmatprep.subr.mxu1 %v2690_v0 }
  0x4e   :  { %306 = vmatpush1.msra.mxu0 %v2060_v19  ;;  %1554 = vmatpush3.msra.mxu1 %v2087_v27 }
  0x4f   :  { %307 = vmatprep.subr.mxu0 %v2064_v20  ;;  %1555 = vmatprep.subr.mxu1 %v2690_v0 }
  0x50   :  { %308 = vmatpush1.msra.mxu0 %v2070_v22  ;;  %1556 = vmatpush3.msra.mxu1 %v2097_v30 }
  0x51   :  { %309 = vmatprep.subr.mxu0 %v2074_v23  ;;  %1557 = vmatprep.subr.mxu1 %v2690_v0 }
  0x52   :  { %310 = vmatpush1.msra.mxu0 %v2080_v25  ;;  %1558 = vmatpush3.msra.mxu1 %v2107_v33 }
  0x53   :  { %311 = vmatprep.subr.mxu0 %v2084_v26  ;;  %1559 = vmatprep.subr.mxu1 %v2690_v0 }
  0x54   :  { %312 = vmatpush1.msra.mxu0 %v2090_v28  ;;  %1560 = vmatpush3.msra.mxu1 %v2117_v36 }
  0x55   :  { %313 = vmatprep.subr.mxu0 %v2094_v29  ;;  %1561 = vmatprep.subr.mxu1 %v2690_v0 }
  0x56   :  { %314 = vmatpush1.msra.mxu0 %v2100_v31  ;;  %1562 = vmatpush3.msra.mxu1 %v2127_v39 }
  0x57   :  { %315 = vmatprep.subr.mxu0 %v2104_v32  ;;  %1563 = vmatprep.subr.mxu1 %v2690_v0 }
  0x58   :  { %316 = vmatpush1.msra.mxu0 %v2110_v34  ;;  %1564 = vmatpush3.msra.mxu1 %v2137_v42 }
  0x59   :  { %317 = vmatprep.subr.mxu0 %v2114_v35  ;;  %1565 = vmatprep.subr.mxu1 %v2690_v0 }
  0x5a   :  { %318 = vmatpush1.msra.mxu0 %v2120_v37  ;;  %1566 = vmatpush3.msra.mxu1 %v2145_v44 }
  0x5b   :  { %319 = vmatprep.subr.mxu0 %v2124_v38  ;;  %1567 = vmatprep.subr.mxu1 %v2690_v0 }
  0x5c   :  { %320 = vmatpush1.msra.mxu0 %v2130_v40  ;;  %1568 = vmatpush3.msra.mxu1 %v2151_v45 }
  0x5d   :  { %321 = vmatprep.subr.mxu0 %v2134_v41  ;;  %355 = vmatprep.mubr.f32.mxu0 %v2690_v0 }
  0x5e   :  { %322 = vmatpush1.msra.mxu0 %v2140_v43  ;;  %1569 = vmatprep.subr.mxu1 %v2690_v0 }
  0x5f   :  { %1575 = vmatprep.mubr.msk.f32.mxu1 %vm1952_vm0, %v2690_v0  ;;  %1570 = vmatpush3.msra.mxu1 %v2156_v46 }
  0x60   :  { %456 = vmatprep.subr.mxu0 %v2009_v1  ;;  %1571 = vmatprep.subr.mxu1 %v2690_v0 }
  0x61   :  { %1572 = vmatpush3.msra.mxu1 %v2162_v47 }
  0x62   :  { %1573 = vmatprep.subr.mxu1 %v2690_v0 }
  0x63   :  { %1574 = vmatpush3.msra.mxu1 %v2168_v48 }
  0x64   :  { %1578 = vmatprep.subr.mxu1 %v2690_v0 }
  0xff   :  { %v192_v56 = vpop.f32.mrf.mxu0 }
 0x100   :  { %v193_v57 = vadd.f32 %v192_v56, %v2242_v53  ;;  %v2254_v56 = vrot.slane %v106_v52, %v121_v54  ;;  %v2711_v54 = vld [vmem:[#allocation15_spill] sm:$0xff] }
 0x101   :  { %v194_v59 = vpop.f32.mrf.mxu0 }
 0x102   :  { %v267_v60 = vadd.f32 %v193_v57, %v107_v55  ;;  %v195_v62 = vadd.f32 %v194_v59, %v2248_v58  ;;  %v263_v51 = vpop.f32.mrf.mxu1 }
 0x103   :  { %v264_v59 = vadd.f32 %v263_v51, %v2254_v56  ;;  %v2710_v51 = vld [vmem:[#allocation13_spill] sm:$0xff] }
 0x104   :  { %v1360_v61 = vmul.f32 -1.442695, %v267_v60  ;;  %v268_v49 = vadd.f32 %v195_v62, %v108_v63  ;;  %v1542_v0 = vpop.f32.mrf.mxu1 }
 0x106   :  { %1787 = vpow2.f32 %v1360_v61  ;;  %v1361_v1 = vmul.f32 -1.442695, %v268_v49  ;;  %v109_v61 = vld [vmem:[%s2681_s0 + $0x10] sm:$0xff]  ;;  %v2709_v49 = vmov 0.0  }
 0x108   :  { %1789 = vpow2.f32 %v1361_v1 }
 0x113   :  { %v1788_v48 = vpop.eup %1787 }
 0x114   :  { %v275_v43 = vadd.f32 1.0, %v1788_v48 }
 0x115   :  { %v1790_v55 = vpop.eup %1789 }
 0x116   :  { %1791 = vrcp.f32 %v275_v43  ;;  %v276_v57 = vadd.f32 1.0, %v1790_v55  ;;  %v2712_v55 = vld [vmem:[#allocation11_spill] sm:$0xff] }
 0x118   :  { %1793 = vrcp.f32 %v276_v57  ;;  %v288_v57 = vld [vmem:[%s2681_s0 + $0x18] sm:$0xff] }
 0x123   :  { %v1792_v60 = vpop.eup %1791 }
 0x124   :  { %v281_v62 = vmul.f32 %v1792_v60, %v264_v59 }
 0x125   :  { %v1794_v1 = vpop.eup %1793 }
 0x126   :  { %v282_v0 = vadd.f32 %v281_v62, %v109_v61  ;;  %v284_v63 = vsub.f32 1.0, %v1794_v1  ;;  %v286_v50 = vmul.f32 0.0, %v1794_v1 }
 0x128   :  { %1795 = vtanh.f32 %v282_v0 }
 0x135   :  { %v1796_v48 = vpop.eup %1795 }
 0x136   :  { %v285_v43 = vmul.f32 %v1796_v48, %v284_v63 }
 0x138   :  { %v2260_v52 = vadd.f32 %v286_v50, %v285_v43  ;;  %v289_v43 = vld [vmem:[%s2681_s0 + $0x20] sm:$0xff] }
 0x13a   :  { %2708 = vst [vmem:[#allocation16_spill] sm:$0xff] %v2260_v52  ;;  %356 = vmatmul.mubr.f32.vlgmr.msra.gmra.mxu0 %v2260_v52  ;;  %1576 = vmatmul.mubr.f32.vlgmr.msra.gmra.mxu1 %v2260_v52 }
 0x13b   :  { %457 = vmatpush1.msra.mxu0 %v2011_v2  ;;  %1579 = vmatpush3.msra.mxu1 %v2045_v14 }
 0x13c   :  { %458 = vmatprep.subr.mxu0 %v2013_v3  ;;  %1580 = vmatprep.subr.mxu1 %v2709_v49 }
 0x13d   :  { %459 = vmatpush1.msra.mxu0 %v2016_v4  ;;  %1581 = vmatpush3.msra.mxu1 %v2051_v16 }
 0x13e   :  { %460 = vmatprep.subr.mxu0 %v2019_v5  ;;  %1582 = vmatprep.subr.mxu1 %v2709_v49 }
 0x13f   :  { %461 = vmatpush1.msra.mxu0 %v2022_v6  ;;  %1583 = vmatpush3.msra.mxu1 %v2057_v18 }
 0x140   :  { %462 = vmatprep.subr.mxu0 %v2025_v7  ;;  %1584 = vmatprep.subr.mxu1 %v2709_v49 }
 0x141   :  { %463 = vmatpush1.msra.mxu0 %v2028_v8  ;;  %1585 = vmatpush3.msra.mxu1 %v2067_v21 }
 0x142   :  { %464 = vmatprep.subr.mxu0 %v2031_v9  ;;  %1586 = vmatprep.subr.mxu1 %v2709_v49 }
 0x143   :  { %465 = vmatpush1.msra.mxu0 %v2034_v10  ;;  %1587 = vmatpush3.msra.mxu1 %v2077_v24 }
 0x144   :  { %466 = vmatprep.subr.mxu0 %v2037_v11  ;;  %1588 = vmatprep.subr.mxu1 %v2709_v49 }
 0x145   :  { %467 = vmatpush1.msra.mxu0 %v2040_v12  ;;  %1589 = vmatpush3.msra.mxu1 %v2087_v27 }
 0x146   :  { %468 = vmatprep.subr.mxu0 %v2043_v13  ;;  %1590 = vmatprep.subr.mxu1 %v2709_v49 }
 0x147   :  { %469 = vmatpush1.msra.mxu0 %v2048_v15  ;;  %1591 = vmatpush3.msra.mxu1 %v2097_v30 }
 0x148   :  { %470 = vmatprep.subr.mxu0 %v2054_v17  ;;  %1592 = vmatprep.subr.mxu1 %v2709_v49 }
 0x149   :  { %471 = vmatpush1.msra.mxu0 %v2060_v19  ;;  %1593 = vmatpush3.msra.mxu1 %v2107_v33 }
 0x14a   :  { %472 = vmatprep.subr.mxu0 %v2064_v20  ;;  %1594 = vmatprep.subr.mxu1 %v2709_v49 }
 0x14b   :  { %473 = vmatpush1.msra.mxu0 %v2070_v22  ;;  %1595 = vmatpush3.msra.mxu1 %v2117_v36 }
 0x14c   :  { %474 = vmatprep.subr.mxu0 %v2074_v23  ;;  %1596 = vmatprep.subr.mxu1 %v2709_v49 }
 0x14d   :  { %475 = vmatpush1.msra.mxu0 %v2080_v25  ;;  %1597 = vmatpush3.msra.mxu1 %v2127_v39 }
 0x14e   :  { %476 = vmatprep.subr.mxu0 %v2084_v26  ;;  %1598 = vmatprep.subr.mxu1 %v2709_v49 }
 0x14f   :  { %477 = vmatpush1.msra.mxu0 %v2090_v28  ;;  %1599 = vmatpush3.msra.mxu1 %v2137_v42 }
 0x150   :  { %478 = vmatprep.subr.mxu0 %v2094_v29  ;;  %1600 = vmatprep.subr.mxu1 %v2709_v49 }
 0x151   :  { %479 = vmatpush1.msra.mxu0 %v2100_v31  ;;  %1601 = vmatpush3.msra.mxu1 %v2145_v44 }
 0x152   :  { %480 = vmatprep.subr.mxu0 %v2104_v32  ;;  %1602 = vmatprep.subr.mxu1 %v2709_v49 }
 0x153   :  { %481 = vmatpush1.msra.mxu0 %v2110_v34  ;;  %1603 = vmatpush3.msra.mxu1 %v2151_v45 }
 0x154   :  { %482 = vmatprep.subr.mxu0 %v2114_v35  ;;  %1604 = vmatprep.subr.mxu1 %v2709_v49 }
 0x155   :  { %483 = vmatpush1.msra.mxu0 %v2120_v37  ;;  %1605 = vmatpush3.msra.mxu1 %v2156_v46 }
 0x156   :  { %484 = vmatprep.subr.mxu0 %v2124_v38  ;;  %1606 = vmatprep.subr.mxu1 %v2709_v49 }
 0x157   :  { %485 = vmatpush1.msra.mxu0 %v2130_v40  ;;  %1607 = vmatpush3.msra.mxu1 %v2162_v47 }
 0x158   :  { %486 = vmatprep.subr.mxu0 %v2134_v41  ;;  %1608 = vmatprep.subr.mxu1 %v2709_v49 }
 0x159   :  { %487 = vmatpush1.msra.mxu0 %v2710_v51  ;;  %520 = vmatprep.mubr.f32.mxu0 %v2709_v49 }
 0x15a   :  { %1609 = vmatpush3.msra.mxu1 %v2711_v54  ;;  %1610 = vmatprep.mubr.msk.f32.mxu1 %vm1952_vm0, %v2709_v49 }
 0x15b   :  { %621 = vmatprep.subr.mxu0 %v2712_v55  ;;  %1613 = vmatprep.subr.mxu1 %v2709_v49 }
 0x1fa   :  { %v357_v59 = vpop.f32.mrf.mxu0  ;;  %v428_v60 = vpop.f32.mrf.mxu1 }
 0x1fb   :  { %v358_v61 = vadd.f32 %v357_v59, %v2242_v53  ;;  %v429_v59 = vadd.f32 %v428_v60, %v2254_v56  ;;  %v2715_v60 = vld [vmem:[#allocation13_spill] sm:$0xff] }
 0x1fc   :  { %v359_v62 = vpop.f32.mrf.mxu0  ;;  %v1577_v0 = vpop.f32.mrf.mxu1 }
 0x1fd   :  { %v432_v1 = vadd.f32 %v358_v61, %v288_v57  ;;  %v360_v48 = vadd.f32 %v359_v62, %v2248_v58  ;;  %v290_v57 = vld [vmem:[%s2681_s0 + $0x28] sm:$0xff] }
 0x1ff   :  { %v1362_v63 = vmul.f32 -1.442695, %v432_v1  ;;  %v433_v50 = vadd.f32 %v360_v48, %v289_v43  ;;  %v2716_v43 = vld [vmem:[#allocation15_spill] sm:$0xff] }
 0x201   :  { %1797 = vpow2.f32 %v1362_v63  ;;  %v1363_v55 = vmul.f32 -1.442695, %v433_v50  ;;  %v2717_v50 = vld [vmem:[#allocation11_spill] sm:$0xff] }
 0x203   :  { %1799 = vpow2.f32 %v1363_v55 }
 0x20e   :  { %v1798_v54 = vpop.eup %1797 }
 0x20f   :  { %v440_v51 = vadd.f32 1.0, %v1798_v54 }
 0x210   :  { %v1800_v41 = vpop.eup %1799 }
 0x211   :  { %1801 = vrcp.f32 %v440_v51  ;;  %v441_v47 = vadd.f32 1.0, %v1800_v41  ;;  %v2713_v41 = vld [vmem:[#allocation14_spill] sm:$0xff] }
 0x213   :  { %1803 = vrcp.f32 %v441_v47  ;;  %v2714_v47 = vld [vmem:[#allocation12_spill] sm:$0xff] }
 0x21e   :  { %v1802_v0 = vpop.eup %1801 }
 0x21f   :  { %v446_v61 = vmul.f32 %v1802_v0, %v429_v59  ;;  %v453_v59 = vld [vmem:[%s2681_s0 + $0x30] sm:$0xff] }
 0x220   :  { %v1804_v1 = vpop.eup %1803 }
 0x221   :  { %v447_v62 = vadd.f32 %v446_v61, %v290_v57  ;;  %v449_v63 = vsub.f32 1.0, %v1804_v1  ;;  %v451_v54 = vmul.f32 %v1804_v1, %v2260_v52 }
 0x223   :  { %1805 = vtanh.f32 %v447_v62 }
 0x230   :  { %v1806_v48 = vpop.eup %1805 }
 0x231   :  { %v450_v55 = vmul.f32 %v1806_v48, %v449_v63 }
 0x233   :  { %v2344_v51 = vadd.f32 %v451_v54, %v450_v55  ;;  %v454_v54 = vld [vmem:[%s2681_s0 + $0x38] sm:$0xff] }
 0x235   :  { %521 = vmatmul.mubr.f32.vlgmr.msra.gmra.mxu0 %v2344_v51  ;;  %1611 = vmatmul.mubr.f32.vlgmr.msra.gmra.mxu1 %v2344_v51 }
 0x236   :  { %622 = vmatpush1.msra.mxu0 %v2011_v2  ;;  %1614 = vmatpush3.msra.mxu1 %v2045_v14 }
 0x237   :  { %623 = vmatprep.subr.mxu0 %v2013_v3  ;;  %1615 = vmatprep.subr.mxu1 %v2709_v49 }
 0x238   :  { %624 = vmatpush1.msra.mxu0 %v2016_v4  ;;  %1616 = vmatpush3.msra.mxu1 %v2051_v16 }
 0x239   :  { %625 = vmatprep.subr.mxu0 %v2019_v5  ;;  %1617 = vmatprep.subr.mxu1 %v2709_v49 }
 0x23a   :  { %626 = vmatpush1.msra.mxu0 %v2022_v6  ;;  %1618 = vmatpush3.msra.mxu1 %v2057_v18 }
 0x23b   :  { %627 = vmatprep.subr.mxu0 %v2025_v7  ;;  %1619 = vmatprep.subr.mxu1 %v2709_v49 }
 0x23c   :  { %628 = vmatpush1.msra.mxu0 %v2028_v8  ;;  %1620 = vmatpush3.msra.mxu1 %v2067_v21 }
 0x23d   :  { %629 = vmatprep.subr.mxu0 %v2031_v9  ;;  %1621 = vmatprep.subr.mxu1 %v2709_v49 }
 0x23e   :  { %630 = vmatpush1.msra.mxu0 %v2034_v10  ;;  %1622 = vmatpush3.msra.mxu1 %v2077_v24 }
 0x23f   :  { %631 = vmatprep.subr.mxu0 %v2037_v11  ;;  %1623 = vmatprep.subr.mxu1 %v2709_v49 }
 0x240   :  { %632 = vmatpush1.msra.mxu0 %v2040_v12  ;;  %1624 = vmatpush3.msra.mxu1 %v2087_v27 }
 0x241   :  { %633 = vmatprep.subr.mxu0 %v2043_v13  ;;  %1625 = vmatprep.subr.mxu1 %v2709_v49 }
 0x242   :  { %634 = vmatpush1.msra.mxu0 %v2048_v15  ;;  %1626 = vmatpush3.msra.mxu1 %v2097_v30 }
 0x243   :  { %635 = vmatprep.subr.mxu0 %v2054_v17  ;;  %1627 = vmatprep.subr.mxu1 %v2709_v49 }
 0x244   :  { %636 = vmatpush1.msra.mxu0 %v2060_v19  ;;  %1628 = vmatpush3.msra.mxu1 %v2107_v33 }
 0x245   :  { %637 = vmatprep.subr.mxu0 %v2064_v20  ;;  %1629 = vmatprep.subr.mxu1 %v2709_v49 }
 0x246   :  { %638 = vmatpush1.msra.mxu0 %v2070_v22  ;;  %1630 = vmatpush3.msra.mxu1 %v2117_v36 }
 0x247   :  { %639 = vmatprep.subr.mxu0 %v2074_v23  ;;  %1631 = vmatprep.subr.mxu1 %v2709_v49 }
 0x248   :  { %640 = vmatpush1.msra.mxu0 %v2080_v25  ;;  %1632 = vmatpush3.msra.mxu1 %v2127_v39 }
 0x249   :  { %641 = vmatprep.subr.mxu0 %v2084_v26  ;;  %1633 = vmatprep.subr.mxu1 %v2709_v49 }
 0x24a   :  { %642 = vmatpush1.msra.mxu0 %v2090_v28  ;;  %1634 = vmatpush3.msra.mxu1 %v2137_v42 }
 0x24b   :  { %643 = vmatprep.subr.mxu0 %v2094_v29  ;;  %1635 = vmatprep.subr.mxu1 %v2709_v49 }
 0x24c   :  { %644 = vmatpush1.msra.mxu0 %v2100_v31  ;;  %1636 = vmatpush3.msra.mxu1 %v2145_v44 }
 0x24d   :  { %645 = vmatprep.subr.mxu0 %v2104_v32  ;;  %1637 = vmatprep.subr.mxu1 %v2709_v49 }
 0x24e   :  { %646 = vmatpush1.msra.mxu0 %v2110_v34  ;;  %1638 = vmatpush3.msra.mxu1 %v2151_v45 }
 0x24f   :  { %647 = vmatprep.subr.mxu0 %v2114_v35  ;;  %1639 = vmatprep.subr.mxu1 %v2709_v49 }
 0x250   :  { %648 = vmatpush1.msra.mxu0 %v2120_v37  ;;  %1640 = vmatpush3.msra.mxu1 %v2156_v46 }
 0x251   :  { %649 = vmatprep.subr.mxu0 %v2124_v38  ;;  %1641 = vmatprep.subr.mxu1 %v2709_v49 }
 0x252   :  { %650 = vmatpush1.msra.mxu0 %v2130_v40  ;;  %1642 = vmatpush3.msra.mxu1 %v2713_v41 }
 0x253   :  { %651 = vmatprep.subr.mxu0 %v2714_v47  ;;  %1643 = vmatprep.subr.mxu1 %v2709_v49 }
 0x254   :  { %652 = vmatpush1.msra.mxu0 %v2715_v60  ;;  %685 = vmatprep.mubr.f32.mxu0 %v2709_v49 }
 0x255   :  { %1644 = vmatpush3.msra.mxu1 %v2716_v43  ;;  %1645 = vmatprep.mubr.msk.f32.mxu1 %vm1952_vm0, %v2709_v49 }
 0x256   :  { %786 = vmatprep.subr.mxu0 %v2717_v50  ;;  %1648 = vmatprep.subr.mxu1 %v2709_v49 }
 0x2f5   :  { %v522_v0 = vpop.f32.mrf.mxu0  ;;  %v593_v57 = vpop.f32.mrf.mxu1 }
 0x2f6   :  { %v523_v61 = vadd.f32 %v522_v0, %v2242_v53  ;;  %v594_v0 = vadd.f32 %v593_v57, %v2254_v56 }
 0x2f7   :  { %v524_v62 = vpop.f32.mrf.mxu0  ;;  %v1612_v1 = vpop.f32.mrf.mxu1 }
 0x2f8   :  { %v597_v63 = vadd.f32 %v523_v61, %v453_v59  ;;  %v525_v55 = vadd.f32 %v524_v62, %v2248_v58  ;;  %v455_v59 = vld [vmem:[%s2681_s0 + $0x40] sm:$0xff] }
 0x2fa   :  { %v1364_v48 = vmul.f32 -1.442695, %v597_v63  ;;  %v598_v52 = vadd.f32 %v525_v55, %v454_v54  ;;  %v620_v55 = vld [vmem:[%s2681_s0 + $0x58] sm:$0xff] }
 0x2fc   :  { %1807 = vpow2.f32 %v1364_v48  ;;  %v1365_v50 = vmul.f32 -1.442695, %v598_v52 }
 0x2fe   :  { %1809 = vpow2.f32 %v1365_v50 }
 0x309   :  { %v1808_v43 = vpop.eup %1807 }
 0x30a   :  { %v605_v60 = vadd.f32 1.0, %v1808_v43 }
 0x30b   :  { %v1810_v47 = vpop.eup %1809 }
 0x30c   :  { %1811 = vrcp.f32 %v605_v60  ;;  %v606_v41 = vadd.f32 1.0, %v1810_v47 }
 0x30e   :  { %1813 = vrcp.f32 %v606_v41 }
 0x319   :  { %v1812_v1 = vpop.eup %1811 }
 0x31a   :  { %v611_v61 = vmul.f32 %v1812_v1, %v594_v0 }
 0x31b   :  { %v1814_v63 = vpop.eup %1813 }
 0x31c   :  { %v612_v62 = vadd.f32 %v611_v61, %v455_v59  ;;  %v614_v48 = vsub.f32 1.0, %v1814_v63  ;;  %v616_v43 = vmul.f32 %v1814_v63, %v2344_v51 }
 0x31e   :  { %1815 = vtanh.f32 %v612_v62 }
 0x32b   :  { %v1816_v52 = vpop.eup %1815 }
 0x32c   :  { %v615_v50 = vmul.f32 %v1816_v52, %v614_v48  ;;  %v1859_v52 = vld [vmem:[#allocation2 + $0x168] sm:$0xff] }
 0x32e   :  { %v2428_v60 = vadd.f32 %v616_v43, %v615_v50  ;;  %v1860_v50 = vld [vmem:[#allocation2 + $0x158] sm:$0xff]  ;;  %v1861_v43 = vld [vmem:[#allocation2 + $0x150] sm:$0xff] }
 0x330   :  { %686 = vmatmul.mubr.f32.vlgmr.msra.gmra.mxu0 %v2428_v60  ;;  %1646 = vmatmul.mubr.f32.vlgmr.msra.gmra.mxu1 %v2428_v60 }
 0x331   :  { %787 = vmatpush1.msra.mxu0 %v2011_v2  ;;  %1649 = vmatpush3.msra.mxu1 %v2045_v14  ;;  %v2718_v2 = vld [vmem:[#allocation14_spill] sm:$0xff] }
 0x332   :  { %788 = vmatprep.subr.mxu0 %v2013_v3  ;;  %1650 = vmatprep.subr.mxu1 %v2709_v49  ;;  %v2719_v3 = vld [vmem:[#allocation12_spill] sm:$0xff] }
 0x333   :  { %789 = vmatpush1.msra.mxu0 %v2016_v4  ;;  %1651 = vmatpush3.msra.mxu1 %v2051_v16  ;;  %v2720_v4 = vld [vmem:[#allocation13_spill] sm:$0xff] }
 0x334   :  { %790 = vmatprep.subr.mxu0 %v2019_v5  ;;  %1652 = vmatprep.subr.mxu1 %v2709_v49  ;;  %v2721_v5 = vld [vmem:[#allocation15_spill] sm:$0xff] }
 0x335   :  { %791 = vmatpush1.msra.mxu0 %v2022_v6  ;;  %1653 = vmatpush3.msra.mxu1 %v2057_v18  ;;  %v2722_v6 = vld [vmem:[#allocation11_spill] sm:$0xff] }
 0x336   :  { %792 = vmatprep.subr.mxu0 %v2025_v7  ;;  %1654 = vmatprep.subr.mxu1 %v2709_v49  ;;  %v618_v7 = vld [vmem:[%s2681_s0 + $0x48] sm:$0xff] }
 0x337   :  { %793 = vmatpush1.msra.mxu0 %v2028_v8  ;;  %1655 = vmatpush3.msra.mxu1 %v2067_v21 }
 0x338   :  { %794 = vmatprep.subr.mxu0 %v2031_v9  ;;  %1656 = vmatprep.subr.mxu1 %v2709_v49 }
 0x339   :  { %795 = vmatpush1.msra.mxu0 %v2034_v10  ;;  %1657 = vmatpush3.msra.mxu1 %v2077_v24 }
 0x33a   :  { %796 = vmatprep.subr.mxu0 %v2037_v11  ;;  %1658 = vmatprep.subr.mxu1 %v2709_v49 }
 0x33b   :  { %797 = vmatpush1.msra.mxu0 %v2040_v12  ;;  %1659 = vmatpush3.msra.mxu1 %v2087_v27 }
 0x33c   :  { %798 = vmatprep.subr.mxu0 %v2043_v13  ;;  %1660 = vmatprep.subr.mxu1 %v2709_v49 }
 0x33d   :  { %799 = vmatpush1.msra.mxu0 %v2048_v15  ;;  %1661 = vmatpush3.msra.mxu1 %v2097_v30 }
 0x33e   :  { %800 = vmatprep.subr.mxu0 %v2054_v17  ;;  %1662 = vmatprep.subr.mxu1 %v2709_v49 }
 0x33f   :  { %801 = vmatpush1.msra.mxu0 %v2060_v19  ;;  %1663 = vmatpush3.msra.mxu1 %v2107_v33  ;;  %v619_v19 = vld [vmem:[%s2681_s0 + $0x50] sm:$0xff] }
 0x340   :  { %802 = vmatprep.subr.mxu0 %v2064_v20  ;;  %1664 = vmatprep.subr.mxu1 %v2709_v49 }
 0x341   :  { %803 = vmatpush1.msra.mxu0 %v2070_v22  ;;  %1665 = vmatpush3.msra.mxu1 %v2117_v36 }
 0x342   :  { %804 = vmatprep.subr.mxu0 %v2074_v23  ;;  %1666 = vmatprep.subr.mxu1 %v2709_v49 }
 0x343   :  { %805 = vmatpush1.msra.mxu0 %v2080_v25  ;;  %1667 = vmatpush3.msra.mxu1 %v2127_v39 }
 0x344   :  { %806 = vmatprep.subr.mxu0 %v2084_v26  ;;  %1668 = vmatprep.subr.mxu1 %v2709_v49 }
 0x345   :  { %807 = vmatpush1.msra.mxu0 %v2090_v28  ;;  %1669 = vmatpush3.msra.mxu1 %v2137_v42 }
 0x346   :  { %808 = vmatprep.subr.mxu0 %v2094_v29  ;;  %1670 = vmatprep.subr.mxu1 %v2709_v49 }
 0x347   :  { %809 = vmatpush1.msra.mxu0 %v2100_v31  ;;  %1671 = vmatpush3.msra.mxu1 %v2145_v44 }
 0x348   :  { %810 = vmatprep.subr.mxu0 %v2104_v32  ;;  %1672 = vmatprep.subr.mxu1 %v2709_v49 }
 0x349   :  { %811 = vmatpush1.msra.mxu0 %v2110_v34  ;;  %1673 = vmatpush3.msra.mxu1 %v2151_v45 }
 0x34a   :  { %812 = vmatprep.subr.mxu0 %v2114_v35  ;;  %1674 = vmatprep.subr.mxu1 %v2709_v49 }
 0x34b   :  { %813 = vmatpush1.msra.mxu0 %v2120_v37  ;;  %1675 = vmatpush3.msra.mxu1 %v2156_v46 }
 0x34c   :  { %814 = vmatprep.subr.mxu0 %v2124_v38  ;;  %1676 = vmatprep.subr.mxu1 %v2709_v49 }
 0x34d   :  { %815 = vmatpush1.msra.mxu0 %v2130_v40  ;;  %1677 = vmatpush3.msra.mxu1 %v2718_v2 }
 0x34e   :  { %816 = vmatprep.subr.mxu0 %v2719_v3  ;;  %1678 = vmatprep.subr.mxu1 %v2709_v49 }
 0x34f   :  { %817 = vmatpush1.msra.mxu0 %v2720_v4  ;;  %850 = vmatprep.mubr.f32.mxu0 %v2709_v49 }
 0x350   :  { %1679 = vmatpush3.msra.mxu1 %v2721_v5  ;;  %1680 = vmatprep.mubr.msk.f32.mxu1 %vm1952_vm0, %v2709_v49 }
 0x351   :  { %951 = vmatprep.subr.mxu0 %v2722_v6  ;;  %1683 = vmatprep.subr.mxu1 %v2709_v49  ;;  %v1862_v6 = vld [vmem:[#allocation2 + $0x140] sm:$0xff] }
 0x3f0   :  { %v687_v8 = vpop.f32.mrf.mxu0  ;;  %v758_v9 = vpop.f32.mrf.mxu1 }
 0x3f1   :  { %v688_v10 = vadd.f32 %v687_v8, %v2242_v53  ;;  %v759_v47 = vadd.f32 %v758_v9, %v2254_v56  ;;  %v1864_v8 = vld [vmem:[#allocation2 + $0x128] sm:$0xff]  ;;  %v1866_v9 = vld [vmem:[#allocation2 + $0x110] sm:$0xff] }
 0x3f2   :  { %v689_v11 = vpop.f32.mrf.mxu0  ;;  %v1647_v12 = vpop.f32.mrf.mxu1 }
 0x3f3   :  { %v762_v13 = vadd.f32 %v688_v10, %v618_v7  ;;  %v690_v17 = vadd.f32 %v689_v11, %v2248_v58  ;;  %v1863_v7 = vld [vmem:[#allocation2 + $0x138] sm:$0xff]  ;;  %v1870_v11 = vld [vmem:[#allocation2 + $0xe0] sm:$0xff]  ;;  %v1872_v12 = vld [vmem:[#allocation2 + $0xc8] sm:$0xff] }
 0x3f4   :  { %v1868_v10 = vld [vmem:[#allocation2 + $0xf8] sm:$0xff] }
 0x3f5   :  { %v1366_v15 = vmul.f32 -1.442695, %v762_v13  ;;  %v763_v20 = vadd.f32 %v690_v17, %v619_v19  ;;  %v1874_v13 = vld [vmem:[#allocation2 + $0xb0] sm:$0xff]  ;;  %v1878_v17 = vld [vmem:[#allocation2 + $0x80] sm:$0xff] }
 0x3f7   :  { %1817 = vpow2.f32 %v1366_v15  ;;  %v1367_v22 = vmul.f32 -1.442695, %v763_v20  ;;  %v1876_v15 = vld [vmem:[#allocation2 + $0x98] sm:$0xff] }
 0x3f9   :  { %1819 = vpow2.f32 %v1367_v22 }
 0x404   :  { %v1818_v23 = vpop.eup %1817 }
 0x405   :  { %v770_v25 = vadd.f32 1.0, %v1818_v23 }
 0x406   :  { %v1820_v26 = vpop.eup %1819 }
 0x407   :  { %1821 = vrcp.f32 %v770_v25  ;;  %v771_v41 = vadd.f32 1.0, %v1820_v26 }
 0x409   :  { %1823 = vrcp.f32 %v771_v41 }
 0x414   :  { %v1822_v57 = vpop.eup %1821 }
 0x415   :  { %v776_v54 = vmul.f32 %v1822_v57, %v759_v47  ;;  %v1127_v57 = vld [vmem:[%s2685_s4 + $0x70] sm:$0xff] }
 0x416   :  { %v1824_v1 = vpop.eup %1823 }
 0x417   :  { %v777_v0 = vadd.f32 %v776_v54, %v620_v55  ;;  %v779_v59 = vsub.f32 1.0, %v1824_v1  ;;  %v781_v63 = vmul.f32 %v1824_v1, %v2428_v60  ;;  %v2723_v55 = vld [vmem:[#allocation16_spill] sm:$0xff]  ;;  %v1126_v54 = vld [vmem:[%s2685_s4 + $0x68] sm:$0xff]  ;;  %v1124_v1 = vld [vmem:[%s2685_s4 + $0x58] sm:$0xff] }
 0x419   :  { %1825 = vtanh.f32 %v777_v0  ;;  %v1125_v0 = vld [vmem:[%s2685_s4 + $0x60] sm:$0xff] }
 0x426   :  { %v1826_v61 = vpop.eup %1825 }
 0x427   :  { %v780_v62 = vmul.f32 %v1826_v61, %v779_v59  ;;  %v1123_v59 = vld [vmem:[%s2685_s4 + $0x50] sm:$0xff]  ;;  %v1122_v61 = vld [vmem:[%s2685_s4 + $0x48] sm:$0xff] }
 0x429   :  { %v2512_v48 = vadd.f32 %v781_v63, %v780_v62  ;;  %v1121_v62 = vld [vmem:[%s2685_s4 + $0x40] sm:$0xff]  ;;  %v1120_v63 = vld [vmem:[%s2685_s4 + $0x38] sm:$0xff] }
 0x42b   :  { %851 = vmatmul.mubr.f32.vlgmr.msra.gmra.mxu0 %v2512_v48  ;;  %1681 = vmatmul.mubr.f32.vlgmr.msra.gmra.mxu1 %v2512_v48 }
 0x42c   :  { %952 = vmatpush1.msra.mxu0 %v1859_v52  ;;  %1684 = vmatpush3.msra.mxu1 %v2045_v14  ;;  %v1865_v14 = vld [vmem:[#allocation2 + $0x120] sm:$0xff]  ;;  %v1119_v52 = vld [vmem:[%s2685_s4 + $0x30] sm:$0xff] }
 0x42d   :  { %953 = vmatprep.subr.mxu0 %v1860_v50  ;;  %1685 = vmatprep.subr.mxu1 %v2709_v49  ;;  %v1118_v50 = vld [vmem:[%s2685_s4 + $0x28] sm:$0xff] }
 0x42e   :  { %954 = vmatpush1.msra.mxu0 %v1861_v43  ;;  %1686 = vmatpush3.msra.mxu1 %v2051_v16  ;;  %v1867_v16 = vld [vmem:[#allocation2 + $0x108] sm:$0xff]  ;;  %v1117_v43 = vld [vmem:[%s2685_s4 + $0x20] sm:$0xff] }
 0x42f   :  { %955 = vmatprep.subr.mxu0 %v1862_v6  ;;  %1687 = vmatprep.subr.mxu1 %v2709_v49  ;;  %v1116_v6 = vld [vmem:[%s2685_s4 + $0x18] sm:$0xff] }
 0x430   :  { %956 = vmatpush1.msra.mxu0 %v1863_v7  ;;  %1688 = vmatpush3.msra.mxu1 %v2057_v18  ;;  %v1869_v18 = vld [vmem:[#allocation2 + $0xf0] sm:$0xff] }
 0x431   :  { %957 = vmatprep.subr.mxu0 %v1864_v8  ;;  %1689 = vmatprep.subr.mxu1 %v2709_v49  ;;  %v1115_v7 = vld [vmem:[%s2685_s4 + $0x10] sm:$0xff]  ;;  %v1114_v8 = vld [vmem:[%s2685_s4 + $0x8] sm:$0xff] }
 0x432   :  { %958 = vmatpush1.msra.mxu0 %v1865_v14  ;;  %1690 = vmatpush3.msra.mxu1 %v2067_v21  ;;  %v1871_v21 = vld [vmem:[#allocation2 + $0xd8] sm:$0xff]  ;;  %v1113_v14 = vld [vmem:[%s2685_s4] sm:$0xff] }
 0x433   :  { %959 = vmatprep.subr.mxu0 %v1866_v9  ;;  %1691 = vmatprep.subr.mxu1 %v2709_v49  ;;  %v948_v9 = vld [vmem:[%s2681_s0 + $0x78] sm:$0xff] }
 0x434   :  { %960 = vmatpush1.msra.mxu0 %v1867_v16  ;;  %1692 = vmatpush3.msra.mxu1 %v2077_v24  ;;  %v1873_v24 = vld [vmem:[#allocation2 + $0xc0] sm:$0xff] }
 0x435   :  { %961 = vmatprep.subr.mxu0 %v1868_v10  ;;  %1693 = vmatprep.subr.mxu1 %v2709_v49 }
 0x436   :  { %962 = vmatpush1.msra.mxu0 %v1869_v18  ;;  %1694 = vmatpush3.msra.mxu1 %v2087_v27  ;;  %v1875_v27 = vld [vmem:[#allocation2 + $0xa8] sm:$0xff] }
 0x437   :  { %963 = vmatprep.subr.mxu0 %v1870_v11  ;;  %1695 = vmatprep.subr.mxu1 %v2709_v49 }
 0x438   :  { %964 = vmatpush1.msra.mxu0 %v1871_v21  ;;  %1696 = vmatpush3.msra.mxu1 %v2097_v30  ;;  %v1877_v30 = vld [vmem:[#allocation2 + $0x90] sm:$0xff] }
 0x439   :  { %965 = vmatprep.subr.mxu0 %v1872_v12  ;;  %1697 = vmatprep.subr.mxu1 %v2709_v49 }
 0x43a   :  { %966 = vmatpush1.msra.mxu0 %v1873_v24  ;;  %1698 = vmatpush3.msra.mxu1 %v2107_v33 }
 0x43b   :  { %967 = vmatprep.subr.mxu0 %v1874_v13  ;;  %1699 = vmatprep.subr.mxu1 %v2709_v49 }
 0x43c   :  { %968 = vmatpush1.msra.mxu0 %v1875_v27  ;;  %1700 = vmatpush3.msra.mxu1 %v2117_v36 }
 0x43d   :  { %969 = vmatprep.subr.mxu0 %v1876_v15  ;;  %1701 = vmatprep.subr.mxu1 %v2709_v49 }
 0x43e   :  { %970 = vmatpush1.msra.mxu0 %v1877_v30  ;;  %1702 = vmatpush3.msra.mxu1 %v2127_v39  ;;  %v784_v39 = vld [vmem:[%s2681_s0 + $0x68] sm:$0xff] }
 0x43f   :  { %971 = vmatprep.subr.mxu0 %v1878_v17  ;;  %1703 = vmatprep.subr.mxu1 %v2709_v49 }
 0x440   :  { %972 = vmatpush1.msra.mxu0 %v2090_v28  ;;  %1704 = vmatpush3.msra.mxu1 %v2137_v42  ;;  %v1128_v28 = vld [vmem:[%s2685_s4 + $0x78] sm:$0xff] }
 0x441   :  { %973 = vmatprep.subr.mxu0 %v2094_v29  ;;  %1705 = vmatprep.subr.mxu1 %v2709_v49  ;;  %v783_v29 = vld [vmem:[%s2681_s0 + $0x60] sm:$0xff] }
 0x442   :  { %974 = vmatpush1.msra.mxu0 %v2100_v31  ;;  %1706 = vmatpush3.msra.mxu1 %v2145_v44 }
 0x443   :  { %975 = vmatprep.subr.mxu0 %v2104_v32  ;;  %1707 = vmatprep.subr.mxu1 %v2709_v49 }
 0x444   :  { %976 = vmatpush1.msra.mxu0 %v2110_v34  ;;  %1708 = vmatpush3.msra.mxu1 %v2151_v45 }
 0x445   :  { %977 = vmatprep.subr.mxu0 %v2114_v35  ;;  %1709 = vmatprep.subr.mxu1 %v2709_v49 }
 0x446   :  { %978 = vmatpush1.msra.mxu0 %v2120_v37  ;;  %1710 = vmatpush3.msra.mxu1 %v2156_v46 }
 0x447   :  { %979 = vmatprep.subr.mxu0 %v2124_v38  ;;  %1711 = vmatprep.subr.mxu1 %v2709_v49 }
 0x448   :  { %980 = vmatpush1.msra.mxu0 %v2130_v40  ;;  %1712 = vmatpush3.msra.mxu1 %v2718_v2 }
 0x449   :  { %981 = vmatprep.subr.mxu0 %v2719_v3  ;;  %1713 = vmatprep.subr.mxu1 %v2709_v49 }
 0x44a   :  { %982 = vmatpush1.msra.mxu0 %v2720_v4  ;;  %1015 = vmatprep.mubr.f32.mxu0 %v2709_v49 }
 0x44b   :  { %1714 = vmatpush3.msra.mxu1 %v2721_v5  ;;  %1715 = vmatprep.mubr.msk.f32.mxu1 %vm1952_vm0, %v2709_v49  ;;  %v785_v5 = vld [vmem:[%s2681_s0 + $0x70] sm:$0xff] }
 0x44c   :  { %1759 = vmatprep.subr.mxu1 %v2709_v49  ;;  %1718 = vmatprep.subr.mxu0 %v1128_v28 }
 0x4eb   :  { %v852_v31 = vpop.f32.mrf.mxu0  ;;  %v923_v32 = vpop.f32.mrf.mxu1 }
 0x4ec   :  { %v853_v33 = vadd.f32 %v852_v31, %v2242_v53  ;;  %v924_v3 = vadd.f32 %v923_v32, %v2254_v56 }
 0x4ed   :  { %v854_v34 = vpop.f32.mrf.mxu0  ;;  %v1682_v35 = vpop.f32.mrf.mxu1 }
 0x4ee   :  { %v927_v36 = vadd.f32 %v853_v33, %v783_v29  ;;  %v855_v38 = vadd.f32 %v854_v34, %v2248_v58 }
 0x4f0   :  { %v1368_v37 = vmul.f32 -1.442695, %v927_v36  ;;  %v928_v40 = vadd.f32 %v855_v38, %v784_v39  ;;  %v1261_v38 = vld [vmem:[#allocation5 + $0x38] sm:$0xff]  ;;  %v1259_v39 = vld [vmem:[#allocation5 + $0x28] sm:$0xff] }
 0x4f2   :  { %1827 = vpow2.f32 %v1368_v37  ;;  %v1369_v42 = vmul.f32 -1.442695, %v928_v40  ;;  %v1258_v40 = vld [vmem:[#allocation5 + $0x20] sm:$0xff] }
 0x4f4   :  { %1829 = vpow2.f32 %v1369_v42  ;;  %v1257_v42 = vld [vmem:[#allocation5 + $0x18] sm:$0xff] }
 0x4ff   :  { %v1828_v44 = vpop.eup %1827 }
 0x500   :  { %v935_v45 = vadd.f32 1.0, %v1828_v44  ;;  %v1256_v44 = vld [vmem:[#allocation5 + $0x10] sm:$0xff] }
 0x501   :  { %v1830_v46 = vpop.eup %1829 }
 0x502   :  { %1831 = vrcp.f32 %v935_v45  ;;  %v936_v2 = vadd.f32 1.0, %v1830_v46  ;;  %v1255_v45 = vld [vmem:[#allocation5 + $0x8] sm:$0xff]  ;;  %v1254_v46 = vld [vmem:[#allocation5] sm:$0xff] }
 0x504   :  { %1833 = vrcp.f32 %v936_v2 }
 0x50f   :  { %v1832_v4 = vpop.eup %1831 }
 0x510   :  { %v941_v19 = vmul.f32 %v1832_v4, %v924_v3 }
 0x511   :  { %v1834_v22 = vpop.eup %1833 }
 0x512   :  { %v942_v20 = vadd.f32 %v941_v19, %v785_v5  ;;  %v944_v23 = vsub.f32 1.0, %v1834_v22  ;;  %v946_v41 = vmul.f32 %v1834_v22, %v2512_v48  ;;  %v1372_v5 = vld [vmem:[%s2686_s5] ss:$0 sm:$0xff] }
 0x514   :  { %1835 = vtanh.f32 %v942_v20 }
 0x521   :  { %v1836_v25 = vpop.eup %1835 }
 0x522   :  { %v945_v26 = vmul.f32 %v1836_v25, %v944_v23 }
 0x524   :  { %v2578_v47 = vadd.f32 %v946_v41, %v945_v26 }
 0x526   :  { %1016 = vmatmul.mubr.f32.vlgmr.msra.gmra.mxu0 %v2578_v47  ;;  %1716 = vmatmul.mubr.f32.vlgmr.msra.gmra.mxu1 %v2578_v47 }
 0x527   :  { %1719 = vmatpush3.msra.mxu0 %v1128_v28  ;;  %1750 = vmatprep.mubr.f32.mxu0 %v2723_v55  ;;  %v1237_v55 = vld [vmem:[%s2682_s1] sm:$0xff] }
 0x528   :  { %1720 = vmatprep.subr.mxu0 %v1127_v57  ;;  %1775 = vmatprep.mubr.msk.f32.mxu1 %vm1952_vm0, %v2709_v49 }
 0x529   :  { %1721 = vmatpush3.msra.mxu0 %v1127_v57  ;;  %1760 = vmatpush3.msra.mxu1 %v1261_v38 }
 0x52a   :  { %1722 = vmatprep.subr.mxu0 %v1126_v54  ;;  %1761 = vmatprep.subr.mxu1 %v2709_v49 }
 0x52b   :  { %1723 = vmatpush3.msra.mxu0 %v1126_v54 }
 0x52c   :  { %1724 = vmatprep.subr.mxu0 %v1125_v0 }
 0x52d   :  { %1725 = vmatpush3.msra.mxu0 %v1125_v0 }
 0x52e   :  { %1726 = vmatprep.subr.mxu0 %v1124_v1 }
 0x52f   :  { %1727 = vmatpush3.msra.mxu0 %v1124_v1  ;;  %v1238_v1 = vld [vmem:[%s2682_s1 + $0x8] sm:$0xff] }
 0x530   :  { %1728 = vmatprep.subr.mxu0 %v1123_v59 }
 0x531   :  { %1729 = vmatpush3.msra.mxu0 %v1123_v59  ;;  %v1239_v59 = vld [vmem:[%s2682_s1 + $0x10] sm:$0xff] }
 0x532   :  { %1730 = vmatprep.subr.mxu0 %v1122_v61 }
 0x533   :  { %1731 = vmatpush3.msra.mxu0 %v1122_v61 }
 0x534   :  { %1732 = vmatprep.subr.mxu0 %v1121_v62 }
 0x535   :  { %1733 = vmatpush3.msra.mxu0 %v1121_v62 }
 0x536   :  { %1734 = vmatprep.subr.mxu0 %v1120_v63 }
 0x537   :  { %1735 = vmatpush3.msra.mxu0 %v1120_v63 }
 0x538   :  { %1736 = vmatprep.subr.mxu0 %v1119_v52 }
 0x539   :  { %1737 = vmatpush3.msra.mxu0 %v1119_v52 }
 0x53a   :  { %1738 = vmatprep.subr.mxu0 %v1118_v50 }
 0x53b   :  { %1739 = vmatpush3.msra.mxu0 %v1118_v50 }
 0x53c   :  { %1740 = vmatprep.subr.mxu0 %v1117_v43 }
 0x53d   :  { %1741 = vmatpush3.msra.mxu0 %v1117_v43  ;;  %v1240_v43 = vld [vmem:[%s2682_s1 + $0x18] sm:$0xff] }
 0x53e   :  { %1742 = vmatprep.subr.mxu0 %v1116_v6 }
 0x53f   :  { %1743 = vmatpush3.msra.mxu0 %v1116_v6 }
 0x540   :  { %1744 = vmatprep.subr.mxu0 %v1115_v7 }
 0x541   :  { %1745 = vmatpush3.msra.mxu0 %v1115_v7  ;;  %v1241_v7 = vld [vmem:[%s2682_s1 + $0x20] sm:$0xff] }
 0x542   :  { %1746 = vmatprep.subr.mxu0 %v1114_v8 }
 0x543   :  { %1747 = vmatpush3.msra.mxu0 %v1114_v8 }
 0x544   :  { %1748 = vmatprep.subr.mxu0 %v1113_v14 }
 0x545   :  { %1749 = vmatpush3.msra.mxu0 %v1113_v14 }
 0x546   :  { %1751 = vmatmul.mubr.f32.vlgmr.msra.gmra.mxu0 %v2344_v51 }
 0x547   :  { %1753 = vmatprep.mubr.f32.mxu0 %v2428_v60  ;;  %v949_v60 = vld [vmem:[%s2681_s0 + $0x80] sm:$0xff] }
 0x54a   :  { %1754 = vmatmul.mubr.f32.gmra.mxu0 %v2512_v48 }
 0x54b   :  { %1756 = vmatprep.mubr.f32.mxu0 %v2578_v47 }
 0x5e6   :  { %v1017_v16 = vpop.f32.mrf.mxu0  ;;  %v1088_v10 = vpop.f32.mrf.mxu1 }
 0x5e7   :  { %v1018_v18 = vadd.f32 %v1017_v16, %v2242_v53  ;;  %v1089_v53 = vadd.f32 %v1088_v10, %v2254_v56  ;;  %v1260_v56 = vld [vmem:[#allocation5 + $0x30] sm:$0xff]  ;;  %v1242_v16 = vld [vmem:[%s2682_s1 + $0x28] sm:$0xff] }
 0x5e8   :  { %v1019_v11 = vpop.f32.mrf.mxu0  ;;  %v1717_v21 = vpop.f32.mrf.mxu1  ;;  %1762 = vmatpush3.msra.mxu1 %v1260_v56 }
 0x5e9   :  { %v1092_v12 = vadd.f32 %v1018_v18, %v948_v9  ;;  %v1020_v51 = vadd.f32 %v1019_v11, %v2248_v58  ;;  %v950_v58 = vld [vmem:[%s2681_s0 + $0x88] sm:$0xff]  ;;  %1763 = vmatprep.subr.mxu1 %v2709_v49 }
 0x5ea   :  { %1764 = vmatpush3.msra.mxu1 %v1259_v39 }
 0x5eb   :  { %v1370_v24 = vmul.f32 -1.442695, %v1092_v12  ;;  %v1093_v48 = vadd.f32 %v1020_v51, %v949_v60  ;;  %1765 = vmatprep.subr.mxu1 %v2709_v49 }
 0x5ec   :  { %1766 = vmatpush3.msra.mxu1 %v1258_v40 }
 0x5ed   :  { %1837 = vpow2.f32 %v1370_v24  ;;  %v1371_v13 = vmul.f32 -1.442695, %v1093_v48  ;;  %1767 = vmatprep.subr.mxu1 %v2709_v49  ;;  %v1373_v24 = vld [vmem:[%s2688_s7] ss:$0 sm:$0xff] }
 0x5ee   :  { %1768 = vmatpush3.msra.mxu1 %v1257_v42 }
 0x5ef   :  { %1839 = vpow2.f32 %v1371_v13  ;;  %1769 = vmatprep.subr.mxu1 %v2709_v49 }
 0x5f0   :  { %1770 = vmatpush3.msra.mxu1 %v1256_v44 }
 0x5f1   :  { %1771 = vmatprep.subr.mxu1 %v2709_v49 }
 0x5f2   :  { %1772 = vmatpush3.msra.mxu1 %v1255_v45 }
 0x5f3   :  { %1773 = vmatprep.subr.mxu1 %v2709_v49 }
 0x5f4   :  { %1774 = vmatpush3.msra.mxu1 %v1254_v46 }
 0x5fa   :  { %v1838_v27 = vpop.eup %1837 }
 0x5fb   :  { %v1100_v15 = vadd.f32 1.0, %v1838_v27 }
 0x5fc   :  { %v1840_v30 = vpop.eup %1839 }
 0x5fd   :  { %1841 = vrcp.f32 %v1100_v15  ;;  %v1101_v17 = vadd.f32 1.0, %v1840_v30 }
 0x5ff   :  { %1843 = vrcp.f32 %v1101_v17 }
 0x606   :  { %v1752_v2 = vpop.f32.mrf.mxu0 }
 0x607   :  { %v1208_v22 = vadd.f32 %v1752_v2, %v1372_v5 }
 0x608   :  { %v1202_v3 = vpop.f32.mrf.mxu0 }
 0x609   :  { %v1203_v20 = vadd.f32 %v1372_v5, %v1202_v3 }
 0x60a   :  { %v1842_v28 = vpop.eup %1841  ;;  %v1755_v4 = vpop.f32.mrf.mxu0 }
 0x60b   :  { %v1106_v29 = vmul.f32 %v1842_v28, %v1089_v53  ;;  %v1218_v25 = vadd.f32 %v1755_v4, %v1372_v5 }
 0x60c   :  { %v1844_v32 = vpop.eup %1843  ;;  %v1212_v19 = vpop.f32.mrf.mxu0 }
 0x60d   :  { %v1107_v31 = vadd.f32 %v1106_v29, %v950_v58  ;;  %v1109_v33 = vsub.f32 1.0, %v1844_v32  ;;  %v1111_v36 = vmul.f32 %v1844_v32, %v2578_v47  ;;  %v1213_v23 = vadd.f32 %v1372_v5, %v1212_v19 }
 0x60f   :  { %1845 = vtanh.f32 %v1107_v31 }
 0x610   :  { %1847 = vtanh.f32 %v1203_v20 }
 0x611   :  { %1849 = vtanh.f32 %v1208_v22 }
 0x612   :  { %1851 = vtanh.f32 %v1213_v23 }
 0x613   :  { %1853 = vtanh.f32 %v1218_v25 }
 0x61c   :  { %v1846_v34 = vpop.eup %1845 }
 0x61d   :  { %v1110_v35 = vmul.f32 %v1846_v34, %v1109_v33  ;;  %v1848_v57 = vpop.eup %1847 }
 0x61e   :  { %v1850_v54 = vpop.eup %1849  ;;  %v1243_v61 = vmul.f32 %v1848_v57, %v1237_v55 }
 0x61f   :  { %v1112_v37 = vadd.f32 %v1111_v36, %v1110_v35  ;;  %v1852_v0 = vpop.eup %1851  ;;  %v1244_v62 = vmul.f32 %v1850_v54, %v1238_v1 }
 0x620   :  { %v1245_v63 = vmul.f32 %v1852_v0, %v1239_v59  ;;  %v1854_v50 = vpop.eup %1853 }
 0x621   :  { %1757 = vmatmul.mubr.f32.gmra.mxu0 %v1112_v37  ;;  %v1249_v52 = vadd.f32 %v1244_v62, %v1243_v61  ;;  %v1246_v14 = vmul.f32 %v1854_v50, %v1240_v43 }
 0x623   :  { %v1250_v6 = vadd.f32 %v1249_v52, %v1245_v63 }
 0x625   :  { %v1251_v18 = vadd.f32 %v1250_v6, %v1246_v14 }
 0x6e1   :  { %v1758_v26 = vpop.f32.mrf.mxu0 }
 0x6e2   :  { %v1228_v41 = vadd.f32 %v1758_v26, %v1372_v5 }
 0x6e3   :  { %v1222_v49 = vpop.f32.mrf.mxu0 }
 0x6e4   :  { %v1223_v47 = vadd.f32 %v1372_v5, %v1222_v49  ;;  %1855 = vtanh.f32 %v1228_v41 }
 0x6e6   :  { %1857 = vtanh.f32 %v1223_v47 }
 0x6f1   :  { %v1856_v8 = vpop.eup %1855 }
 0x6f2   :  { %v1248_v11 = vmul.f32 %v1856_v8, %v1242_v16 }
 0x6f3   :  { %v1858_v9 = vpop.eup %1857 }
 0x6f4   :  { %v1247_v10 = vmul.f32 %v1858_v9, %v1241_v7 }
 0x6f6   :  { %v1252_v21 = vadd.f32 %v1251_v18, %v1247_v10 }
 0x6f8   :  { %v1253_v12 = vadd.f32 %v1252_v21, %v1248_v11 }
 0x6fa   :  { %1776 = vmatmul.mubr.msk.f32.vlgmr.msra.gmra.mxu1 %vm1269_vm1, %v1253_v12 }
 0x7ba   :  { %v1339_v51 = vpop.f32.mrf.mxu1 }
 0x7bb   :  { %v1340_v60 = vadd.f32 %v1373_v24, %v1339_v51 }
 0x7bc   :  { %v1777_v48 = vpop.f32.mrf.mxu1 }
 0x7bd   :  { %1343 = vst [vmem:[#allocation7] sm:$0xff] %v1340_v60 }
 0x7be   :  { %1930 = shalt.err (!%p1927_p0)
}
 0x7bf   :  { %1353 = dma.vmem_to_hbm [thread:$0]  %s1351_s25, 128, %s2689_s8, [#allocation4]  }
 0x7c0   :  { %1943 = dma.done.wait [#allocation4], 128  }
 0x7c1   :  { %1944 = vsyncadd [#allocation4], 4294967168 }
 0x7c2   :  { %1357 = vsyncpa [#allocation3], 1 }
 0x7c3   :  { %1358 = vsyncpa [#allocation6], 1 }
 0x7c4   :  { %1359 = vsyncpa [#allocation4], 1 }

</bundles_post_ra>
